<compile_context>
chip_gen: v7x
topology: tpu7x:2x2x1
jax: 0.10.0
libtpu: 0.0.40
codegen_flags: <defaults>
</compile_context>

<pallas_src>
import functools

import numpy as np

import jax
import jax.numpy as jnp
from jax import lax
from jax.experimental import pallas as pl
from jax.experimental.pallas import tpu as pltpu

_BN_EPS = 1e-5


def _vmem_limit_bytes():
    """Generation-aware scoped-VMEM budget (~85% of physical, capped at 100 MiB)."""
    default = 48 * 1024 * 1024          # safe on every generation (v7x has 64 MiB)
    try:
        cap = getattr(pltpu.get_tpu_info(), "vmem_capacity_bytes", None)
        if not cap:
            return default
        return int(min(cap * 85 // 100, 100 * 1024 * 1024))
    except Exception:
        return default


_VMEM_LIMIT = _vmem_limit_bytes()


def _make_tap_masks(H, W):
    """(9, 1, H*W) {0,1} masks: validity of tap (kh, kw) at each output pixel."""
    h = np.arange(H)[:, None]
    w = np.arange(W)[None, :]
    masks = []
    for kh in range(3):
        for kw in range(3):
            dh, dw = kh - 1, kw - 1
            m = ((h + dh >= 0) & (h + dh < H) & (w + dw >= 0) & (w + dw < W))
            masks.append(m.reshape(1, H * W))
    return jnp.asarray(np.stack(masks, axis=0), dtype=jnp.float32)


# ----------------------------------------------------------------------------
# Kernel 1/2: 3x3 "same" conv of one image (optionally with the previous
# layer's BN+ReLU fused into the input load) + per-batch BN partial statistics.
# ----------------------------------------------------------------------------
def _conv3x3_bn_stats_kernel(x_ref, w_ref, m_ref, s_ref, t_ref,
                             y_ref, sum_ref, sq_ref,
                             *, width, fuse_input_bn_relu):
    # x_ref:   (1, Cin, HW)    flattened NCHW image, lane-dense
    # w_ref:   (9, Cout, Cin)  tap-major transposed weights
    # m_ref:   (9, 1, HW)      {0,1} boundary masks (== zero padding)
    # s_ref/t_ref: (Cin, 1)    previous layer's BN scale/shift (unused if not fused)
    # y_ref:   (1, Cout, HW)   raw conv output, lane-dense
    # sum_ref/sq_ref: (1, Cout, 1)  per-batch partial BN statistics
    x = x_ref[0]                                           # (Cin, HW)
    if fuse_input_bn_relu:
        # Previous layer's BatchNorm + ReLU folded into this conv's input load.
        x = jnp.maximum(x * s_ref[...] + t_ref[...], 0.0)

    acc = None
    for kh in range(3):
        for kw in range(3):
            tap = kh * 3 + kw
            d = (kh - 1) * width + (kw - 1)                # flattened-pixel shift
            if d == 0:                                     # center tap: no shift/mask
                shifted = x
            else:
                # shifted[:, p] = x[:, (p + d) mod HW]; wrapped lanes are zeroed
                # by the boundary mask, i.e. zero padding of the (activated) input.
                shifted = jnp.concatenate([x[:, d:], x[:, :d]], axis=1)
                shifted = shifted * m_ref[tap]
            contrib = jnp.dot(w_ref[tap], shifted,
                              preferred_element_type=jnp.float32)
            acc = contrib if acc is None else acc + contrib

    y_ref[0] = acc.astype(y_ref.dtype)
    # Training-mode BatchNorm statistics: per-batch partials (reduced in wrapper).
    sum_ref[0] = jnp.sum(acc, axis=1, keepdims=True)
    sq_ref[0] = jnp.sum(acc * acc, axis=1, keepdims=True)


def conv3x3_bn_stats(x_flat, w_hwio, masks, H, W, scale=None, shift=None):
    """3x3 'same' conv on (N, Cin, H*W) (optionally preceded by fused BN+ReLU).

    Returns (conv output (N, Cout, H*W), per-batch partial channel sums and
    sums-of-squares, each (N, Cout, 1)).
    """
    N, Cin, HW = x_flat.shape
    Cout = w_hwio.shape[-1]

    # (3,3,Cin,Cout) -> (9, Cout, Cin): tap-major, transposed for (Cout,Cin)@(Cin,HW).
    w_t = jnp.transpose(w_hwio.reshape(9, Cin, Cout), (0, 2, 1)).astype(jnp.float32)

    fuse = scale is not None
    if fuse:
        s = scale.reshape(Cin, 1).astype(jnp.float32)
        t = shift.reshape(Cin, 1).astype(jnp.float32)
    else:  # dummies, never read by the kernel
        s = jnp.ones((Cin, 1), jnp.float32)
        t = jnp.zeros((Cin, 1), jnp.float32)

    kernel = functools.partial(_conv3x3_bn_stats_kernel,
                               width=W, fuse_input_bn_relu=fuse)

    y, psum, psq = pl.pallas_call(
        kernel,
        out_shape=(
            jax.ShapeDtypeStruct((N, Cout, HW), jnp.float32),
            jax.ShapeDtypeStruct((N, Cout, 1), jnp.float32),
            jax.ShapeDtypeStruct((N, Cout, 1), jnp.float32),
        ),
        grid_spec=pltpu.PrefetchScalarGridSpec(
            num_scalar_prefetch=0,
            grid=(N,),
            in_specs=[
                pl.BlockSpec((1, Cin, HW), lambda n: (n, 0, 0)),
                pl.BlockSpec((9, Cout, Cin), lambda n: (0, 0, 0)),
                pl.BlockSpec((9, 1, HW), lambda n: (0, 0, 0)),
                pl.BlockSpec((Cin, 1), lambda n: (0, 0)),
                pl.BlockSpec((Cin, 1), lambda n: (0, 0)),
            ],
            out_specs=[
                pl.BlockSpec((1, Cout, HW), lambda n: (n, 0, 0)),
                pl.BlockSpec((1, Cout, 1), lambda n: (n, 0, 0)),
                pl.BlockSpec((1, Cout, 1), lambda n: (n, 0, 0)),
            ],
        ),
        compiler_params=pltpu.CompilerParams(
            # Per-batch partial stats -> no cross-step accumulator -> the batch
            # axis is fully parallel (megacore-shardable on v7x).
            dimension_semantics=("parallel",),
            vmem_limit_bytes=_VMEM_LIMIT,
        ),
    )(x_flat, w_t, masks, s, t)
    return y, psum, psq


# ----------------------------------------------------------------------------
# Kernel 3: final BatchNorm + ReLU on the lane-dense (C, H*W) layout.
# ----------------------------------------------------------------------------
def _bn_relu_kernel(y_ref, s_ref, t_ref, o_ref):
    # y_ref/o_ref: (1, C, HW); s_ref/t_ref: (C, 1)
    o_ref[0] = jnp.maximum(y_ref[0] * s_ref[...] + t_ref[...], 0.0)


def bn_relu_finalize(y_flat, scale, shift):
    N, C, HW = y_flat.shape
    s = scale.reshape(C, 1).astype(jnp.float32)
    t = shift.reshape(C, 1).astype(jnp.float32)
    return pl.pallas_call(
        _bn_relu_kernel,
        out_shape=jax.ShapeDtypeStruct((N, C, HW), jnp.float32),
        grid_spec=pltpu.PrefetchScalarGridSpec(
            num_scalar_prefetch=0,
            grid=(N,),
            in_specs=[
                pl.BlockSpec((1, C, HW), lambda n: (n, 0, 0)),
                pl.BlockSpec((C, 1), lambda n: (0, 0)),
                pl.BlockSpec((C, 1), lambda n: (0, 0)),
            ],
            out_specs=pl.BlockSpec((1, C, HW), lambda n: (n, 0, 0)),
        ),
        compiler_params=pltpu.CompilerParams(
            dimension_semantics=("parallel",),
            vmem_limit_bytes=_VMEM_LIMIT,
        ),
    )(y_flat, s, t)


# ----------------------------------------------------------------------------
# DoubleConv wrapper (NCHW in / NCHW out, like the PyTorch module).
# ----------------------------------------------------------------------------
def _bn_affine(ssum, ssq, gamma, beta, count):
    # Fold training-mode BN (biased variance over N,H,W) into scale/shift (C,1).
    mean = ssum / count
    var = jnp.maximum(ssq / count - mean * mean, 0.0)   # clamp: E[x^2]-m^2 may cancel < 0
    scale = gamma.reshape(-1, 1).astype(jnp.float32) * lax.rsqrt(var + _BN_EPS)
    shift = beta.reshape(-1, 1).astype(jnp.float32) - mean * scale
    return scale, shift


def double_conv(x_nchw, params):
    """(Conv3x3 bias-free -> BN -> ReLU) x 2; spatial dims unchanged."""
    w1, g1, b1, w2, g2, b2 = params
    N, Cin, H, W = x_nchw.shape
    count = float(N * H * W)

    masks = _make_tap_masks(H, W)                 # shared by both convs
    x = x_nchw.reshape(N, Cin, H * W)             # free metadata reshape (no transpose)

    y1, p1s, p1q = conv3x3_bn_stats(x, w1, masks, H, W)          # conv1 + BN1 partials
    s1, t1 = _bn_affine(p1s.sum(axis=0), p1q.sum(axis=0), g1, b1, count)

    y2, p2s, p2q = conv3x3_bn_stats(y1, w2, masks, H, W,         # BN1+ReLU fused in
                                    scale=s1, shift=t1)
    s2, t2 = _bn_affine(p2s.sum(axis=0), p2q.sum(axis=0), g2, b2, count)

    out = bn_relu_finalize(y2, s2, t2)            # BN2 + ReLU, lane-dense
    return out.reshape(N, out.shape[1], H, W)     # free metadata reshape (no transpose)


# ----------------------------------------------------------------------------
# Pure-JAX reference (for correctness check).
# ----------------------------------------------------------------------------
def _ref_double_conv(x_nchw, params):
    w1, g1, b1, w2, g2, b2 = params

    def conv(x_nhwc, w):
        return lax.conv_general_dilated(
            x_nhwc, w, window_strides=(1, 1), padding="SAME",
            dimension_numbers=("NHWC", "HWIO", "NHWC"))

    def bn_relu_ref(y, g, b):
        mean = jnp.mean(y, axis=(0, 1, 2), keepdims=True)
        var = jnp.mean(jnp.square(y - mean), axis=(0, 1, 2), keepdims=True)
        out = (y - mean) * lax.rsqrt(var + _BN_EPS) * g.reshape(1, 1, 1, -1) \
            + b.reshape(1, 1, 1, -1)
        return jnp.maximum(out, 0.0)

    x = jnp.transpose(x_nchw, (0, 2, 3, 1))
    y = bn_relu_ref(conv(x, w1), g1, b1)
    z = bn_relu_ref(conv(y, w2), g2, b2)
    return jnp.transpose(z, (0, 3, 1, 2))


if __name__ == "__main__":
    key = jax.random.PRNGKey(0)
    N, C_in, H, W = 2, 4, 16, 16
    C_out = 8
    C_mid = C_out  # mid_channels defaults to out_channels

    k_x, k_w1, k_w2 = jax.random.split(key, 3)
    x = jax.random.normal(k_x, (N, C_in, H, W), dtype=jnp.float32)

    # Conv weights (HWIO, bias=False); BN gamma=1, beta=0 as in nn.BatchNorm2d.
    w1 = jax.random.normal(k_w1, (3, 3, C_in, C_mid), dtype=jnp.float32) * 0.1
    g1 = jnp.ones((C_mid,), jnp.float32)
    b1 = jnp.zeros((C_mid,), jnp.float32)
    w2 = jax.random.normal(k_w2, (3, 3, C_mid, C_out), dtype=jnp.float32) * 0.1
    g2 = jnp.ones((C_out,), jnp.float32)
    b2 = jnp.zeros((C_out,), jnp.float32)
    params = (w1, g1, b1, w2, g2, b2)

    out = jax.block_until_ready(jax.jit(double_conv)(x, params))
    ref = jax.block_until_ready(_ref_double_conv(x, params))

    assert out.shape == (N, C_out, H, W)
    assert jnp.allclose(out, ref, atol=1e-4, rtol=1e-4), (
        float(jnp.max(jnp.abs(out - ref))))

    print("KERNEL_OK")
</pallas_src>

<mosaic_0001>
module attributes {stable_mosaic.version = 11 : i64} {
  func.func @_conv3x3_bn_stats_kernel(%arg0: i32, %arg1: memref<1x4x256xf32, #tpu.memory_space<vmem>>, %arg2: memref<9x8x4xf32, #tpu.memory_space<vmem>>, %arg3: memref<9x1x256xf32, #tpu.memory_space<vmem>>, %arg4: memref<4x1xf32, #tpu.memory_space<vmem>>, %arg5: memref<4x1xf32, #tpu.memory_space<vmem>>, %arg6: memref<1x8x256xf32, #tpu.memory_space<vmem>>, %arg7: memref<1x8x1xf32, #tpu.memory_space<vmem>>, %arg8: memref<1x8x1xf32, #tpu.memory_space<vmem>>) attributes {dimension_semantics = [#tpu.dimension_semantics<parallel>], iteration_bounds = array<i64: 2>, scalar_prefetch = 0 : i64, scratch_operands = 0 : i64, tpu.core_type = #tpu.core_type<tc>, window_params = [{transform_indices = @transform_0, window_bounds = array<i64: 1, 4, 256>}, {pipeline_mode = #tpu.pipeline_mode<synchronous>, transform_indices = @transform_1, window_bounds = array<i64: 9, 8, 4>}, {pipeline_mode = #tpu.pipeline_mode<synchronous>, transform_indices = @transform_2, window_bounds = array<i64: 9, 1, 256>}, {pipeline_mode = #tpu.pipeline_mode<synchronous>, transform_indices = @transform_3, window_bounds = array<i64: 4, 1>}, {pipeline_mode = #tpu.pipeline_mode<synchronous>, transform_indices = @transform_4, window_bounds = array<i64: 4, 1>}, {transform_indices = @transform_5, window_bounds = array<i64: 1, 8, 256>}, {transform_indices = @transform_6, window_bounds = array<i64: 1, 8, 1>}, {transform_indices = @transform_7, window_bounds = array<i64: 1, 8, 1>}]} {
    %c0 = arith.constant 0 : index
    %c0_0 = arith.constant 0 : index
    %c0_1 = arith.constant 0 : index
    %0 = vector.load %arg1[%c0, %c0_0, %c0_1] : memref<1x4x256xf32, #tpu.memory_space<vmem>>, vector<1x4x256xf32>
    %1 = vector.shape_cast %0 : vector<1x4x256xf32> to vector<4x256xf32>
    %2 = vector.extract_strided_slice %1 {offsets = [0, 239], sizes = [4, 17], strides = [1, 1]} : vector<4x256xf32> to vector<4x17xf32>
    %3 = vector.extract_strided_slice %1 {offsets = [0, 0], sizes = [4, 239], strides = [1, 1]} : vector<4x256xf32> to vector<4x239xf32>
    %4 = tpu.concatenate %2, %3 in 1 : vector<4x17xf32>, vector<4x239xf32> -> vector<4x256xf32>
    %c0_2 = arith.constant 0 : index
    %c0_3 = arith.constant 0 : index
    %c0_4 = arith.constant 0 : index
    %5 = vector.load %arg3[%c0_2, %c0_3, %c0_4] : memref<9x1x256xf32, #tpu.memory_space<vmem>>, vector<1x1x256xf32>
    %6 = vector.shape_cast %5 : vector<1x1x256xf32> to vector<1x256xf32>
    %7 = vector.broadcast %6 : vector<1x256xf32> to vector<4x256xf32>
    %8 = arith.mulf %4, %7 : vector<4x256xf32>
    %c0_5 = arith.constant 0 : index
    %c0_6 = arith.constant 0 : index
    %c0_7 = arith.constant 0 : index
    %9 = vector.load %arg2[%c0_5, %c0_6, %c0_7] : memref<9x8x4xf32, #tpu.memory_space<vmem>>, vector<1x8x4xf32>
    %10 = vector.shape_cast %9 : vector<1x8x4xf32> to vector<8x4xf32>
    %cst = arith.constant dense<0.000000e+00> : vector<8x256xf32>
    %11 = tpu.matmul %10, %8, %cst {dimension_numbers = #tpu.dot_dimension_numbers<[1], [0], [0], [1], [0, 0, 1, 1], [], []>} : vector<8x4xf32>, vector<4x256xf32>, vector<8x256xf32> -> vector<8x256xf32>
    %12 = vector.extract_strided_slice %1 {offsets = [0, 240], sizes = [4, 16], strides = [1, 1]} : vector<4x256xf32> to vector<4x16xf32>
    %13 = vector.extract_strided_slice %1 {offsets = [0, 0], sizes = [4, 240], strides = [1, 1]} : vector<4x256xf32> to vector<4x240xf32>
    %14 = tpu.concatenate %12, %13 in 1 : vector<4x16xf32>, vector<4x240xf32> -> vector<4x256xf32>
    %c1 = arith.constant 1 : index
    %c0_8 = arith.constant 0 : index
    %c0_9 = arith.constant 0 : index
    %15 = vector.load %arg3[%c1, %c0_8, %c0_9] : memref<9x1x256xf32, #tpu.memory_space<vmem>>, vector<1x1x256xf32>
    %16 = vector.shape_cast %15 : vector<1x1x256xf32> to vector<1x256xf32>
    %17 = vector.broadcast %16 : vector<1x256xf32> to vector<4x256xf32>
    %18 = arith.mulf %14, %17 : vector<4x256xf32>
    %c1_10 = arith.constant 1 : index
    %c0_11 = arith.constant 0 : index
    %c0_12 = arith.constant 0 : index
    %19 = vector.load %arg2[%c1_10, %c0_11, %c0_12] : memref<9x8x4xf32, #tpu.memory_space<vmem>>, vector<1x8x4xf32>
    %20 = vector.shape_cast %19 : vector<1x8x4xf32> to vector<8x4xf32>
    %cst_13 = arith.constant dense<0.000000e+00> : vector<8x256xf32>
    %21 = tpu.matmul %20, %18, %cst_13 {dimension_numbers = #tpu.dot_dimension_numbers<[1], [0], [0], [1], [0, 0, 1, 1], [], []>} : vector<8x4xf32>, vector<4x256xf32>, vector<8x256xf32> -> vector<8x256xf32>
    %22 = arith.addf %11, %21 : vector<8x256xf32>
    %23 = vector.extract_strided_slice %1 {offsets = [0, 241], sizes = [4, 15], strides = [1, 1]} : vector<4x256xf32> to vector<4x15xf32>
    %24 = vector.extract_strided_slice %1 {offsets = [0, 0], sizes = [4, 241], strides = [1, 1]} : vector<4x256xf32> to vector<4x241xf32>
    %25 = tpu.concatenate %23, %24 in 1 : vector<4x15xf32>, vector<4x241xf32> -> vector<4x256xf32>
    %c2 = arith.constant 2 : index
    %c0_14 = arith.constant 0 : index
    %c0_15 = arith.constant 0 : index
    %26 = vector.load %arg3[%c2, %c0_14, %c0_15] : memref<9x1x256xf32, #tpu.memory_space<vmem>>, vector<1x1x256xf32>
    %27 = vector.shape_cast %26 : vector<1x1x256xf32> to vector<1x256xf32>
    %28 = vector.broadcast %27 : vector<1x256xf32> to vector<4x256xf32>
    %29 = arith.mulf %25, %28 : vector<4x256xf32>
    %c2_16 = arith.constant 2 : index
    %c0_17 = arith.constant 0 : index
    %c0_18 = arith.constant 0 : index
    %30 = vector.load %arg2[%c2_16, %c0_17, %c0_18] : memref<9x8x4xf32, #tpu.memory_space<vmem>>, vector<1x8x4xf32>
    %31 = vector.shape_cast %30 : vector<1x8x4xf32> to vector<8x4xf32>
    %cst_19 = arith.constant dense<0.000000e+00> : vector<8x256xf32>
    %32 = tpu.matmul %31, %29, %cst_19 {dimension_numbers = #tpu.dot_dimension_numbers<[1], [0], [0], [1], [0, 0, 1, 1], [], []>} : vector<8x4xf32>, vector<4x256xf32>, vector<8x256xf32> -> vector<8x256xf32>
    %33 = arith.addf %22, %32 : vector<8x256xf32>
    %34 = vector.extract_strided_slice %1 {offsets = [0, 255], sizes = [4, 1], strides = [1, 1]} : vector<4x256xf32> to vector<4x1xf32>
    %35 = vector.extract_strided_slice %1 {offsets = [0, 0], sizes = [4, 255], strides = [1, 1]} : vector<4x256xf32> to vector<4x255xf32>
    %36 = tpu.concatenate %34, %35 in 1 : vector<4x1xf32>, vector<4x255xf32> -> vector<4x256xf32>
    %c3 = arith.constant 3 : index
    %c0_20 = arith.constant 0 : index
    %c0_21 = arith.constant 0 : index
    %37 = vector.load %arg3[%c3, %c0_20, %c0_21] : memref<9x1x256xf32, #tpu.memory_space<vmem>>, vector<1x1x256xf32>
    %38 = vector.shape_cast %37 : vector<1x1x256xf32> to vector<1x256xf32>
    %39 = vector.broadcast %38 : vector<1x256xf32> to vector<4x256xf32>
    %40 = arith.mulf %36, %39 : vector<4x256xf32>
    %c3_22 = arith.constant 3 : index
    %c0_23 = arith.constant 0 : index
    %c0_24 = arith.constant 0 : index
    %41 = vector.load %arg2[%c3_22, %c0_23, %c0_24] : memref<9x8x4xf32, #tpu.memory_space<vmem>>, vector<1x8x4xf32>
    %42 = vector.shape_cast %41 : vector<1x8x4xf32> to vector<8x4xf32>
    %cst_25 = arith.constant dense<0.000000e+00> : vector<8x256xf32>
    %43 = tpu.matmul %42, %40, %cst_25 {dimension_numbers = #tpu.dot_dimension_numbers<[1], [0], [0], [1], [0, 0, 1, 1], [], []>} : vector<8x4xf32>, vector<4x256xf32>, vector<8x256xf32> -> vector<8x256xf32>
    %44 = arith.addf %33, %43 : vector<8x256xf32>
    %c4 = arith.constant 4 : index
    %c0_26 = arith.constant 0 : index
    %c0_27 = arith.constant 0 : index
    %45 = vector.load %arg2[%c4, %c0_26, %c0_27] : memref<9x8x4xf32, #tpu.memory_space<vmem>>, vector<1x8x4xf32>
    %46 = vector.shape_cast %45 : vector<1x8x4xf32> to vector<8x4xf32>
    %cst_28 = arith.constant dense<0.000000e+00> : vector<8x256xf32>
    %47 = tpu.matmul %46, %1, %cst_28 {dimension_numbers = #tpu.dot_dimension_numbers<[1], [0], [0], [1], [0, 0, 1, 1], [], []>} : vector<8x4xf32>, vector<4x256xf32>, vector<8x256xf32> -> vector<8x256xf32>
    %48 = arith.addf %44, %47 : vector<8x256xf32>
    %49 = vector.extract_strided_slice %1 {offsets = [0, 1], sizes = [4, 255], strides = [1, 1]} : vector<4x256xf32> to vector<4x255xf32>
    %50 = vector.extract_strided_slice %1 {offsets = [0, 0], sizes = [4, 1], strides = [1, 1]} : vector<4x256xf32> to vector<4x1xf32>
    %51 = tpu.concatenate %49, %50 in 1 : vector<4x255xf32>, vector<4x1xf32> -> vector<4x256xf32>
    %c5 = arith.constant 5 : index
    %c0_29 = arith.constant 0 : index
    %c0_30 = arith.constant 0 : index
    %52 = vector.load %arg3[%c5, %c0_29, %c0_30] : memref<9x1x256xf32, #tpu.memory_space<vmem>>, vector<1x1x256xf32>
    %53 = vector.shape_cast %52 : vector<1x1x256xf32> to vector<1x256xf32>
    %54 = vector.broadcast %53 : vector<1x256xf32> to vector<4x256xf32>
    %55 = arith.mulf %51, %54 : vector<4x256xf32>
    %c5_31 = arith.constant 5 : index
    %c0_32 = arith.constant 0 : index
    %c0_33 = arith.constant 0 : index
    %56 = vector.load %arg2[%c5_31, %c0_32, %c0_33] : memref<9x8x4xf32, #tpu.memory_space<vmem>>, vector<1x8x4xf32>
    %57 = vector.shape_cast %56 : vector<1x8x4xf32> to vector<8x4xf32>
    %cst_34 = arith.constant dense<0.000000e+00> : vector<8x256xf32>
    %58 = tpu.matmul %57, %55, %cst_34 {dimension_numbers = #tpu.dot_dimension_numbers<[1], [0], [0], [1], [0, 0, 1, 1], [], []>} : vector<8x4xf32>, vector<4x256xf32>, vector<8x256xf32> -> vector<8x256xf32>
    %59 = arith.addf %48, %58 : vector<8x256xf32>
    %60 = vector.extract_strided_slice %1 {offsets = [0, 15], sizes = [4, 241], strides = [1, 1]} : vector<4x256xf32> to vector<4x241xf32>
    %61 = vector.extract_strided_slice %1 {offsets = [0, 0], sizes = [4, 15], strides = [1, 1]} : vector<4x256xf32> to vector<4x15xf32>
    %62 = tpu.concatenate %60, %61 in 1 : vector<4x241xf32>, vector<4x15xf32> -> vector<4x256xf32>
    %c6 = arith.constant 6 : index
    %c0_35 = arith.constant 0 : index
    %c0_36 = arith.constant 0 : index
    %63 = vector.load %arg3[%c6, %c0_35, %c0_36] : memref<9x1x256xf32, #tpu.memory_space<vmem>>, vector<1x1x256xf32>
    %64 = vector.shape_cast %63 : vector<1x1x256xf32> to vector<1x256xf32>
    %65 = vector.broadcast %64 : vector<1x256xf32> to vector<4x256xf32>
    %66 = arith.mulf %62, %65 : vector<4x256xf32>
    %c6_37 = arith.constant 6 : index
    %c0_38 = arith.constant 0 : index
    %c0_39 = arith.constant 0 : index
    %67 = vector.load %arg2[%c6_37, %c0_38, %c0_39] : memref<9x8x4xf32, #tpu.memory_space<vmem>>, vector<1x8x4xf32>
    %68 = vector.shape_cast %67 : vector<1x8x4xf32> to vector<8x4xf32>
    %cst_40 = arith.constant dense<0.000000e+00> : vector<8x256xf32>
    %69 = tpu.matmul %68, %66, %cst_40 {dimension_numbers = #tpu.dot_dimension_numbers<[1], [0], [0], [1], [0, 0, 1, 1], [], []>} : vector<8x4xf32>, vector<4x256xf32>, vector<8x256xf32> -> vector<8x256xf32>
    %70 = arith.addf %59, %69 : vector<8x256xf32>
    %71 = vector.extract_strided_slice %1 {offsets = [0, 16], sizes = [4, 240], strides = [1, 1]} : vector<4x256xf32> to vector<4x240xf32>
    %72 = vector.extract_strided_slice %1 {offsets = [0, 0], sizes = [4, 16], strides = [1, 1]} : vector<4x256xf32> to vector<4x16xf32>
    %73 = tpu.concatenate %71, %72 in 1 : vector<4x240xf32>, vector<4x16xf32> -> vector<4x256xf32>
    %c7 = arith.constant 7 : index
    %c0_41 = arith.constant 0 : index
    %c0_42 = arith.constant 0 : index
    %74 = vector.load %arg3[%c7, %c0_41, %c0_42] : memref<9x1x256xf32, #tpu.memory_space<vmem>>, vector<1x1x256xf32>
    %75 = vector.shape_cast %74 : vector<1x1x256xf32> to vector<1x256xf32>
    %76 = vector.broadcast %75 : vector<1x256xf32> to vector<4x256xf32>
    %77 = arith.mulf %73, %76 : vector<4x256xf32>
    %c7_43 = arith.constant 7 : index
    %c0_44 = arith.constant 0 : index
    %c0_45 = arith.constant 0 : index
    %78 = vector.load %arg2[%c7_43, %c0_44, %c0_45] : memref<9x8x4xf32, #tpu.memory_space<vmem>>, vector<1x8x4xf32>
    %79 = vector.shape_cast %78 : vector<1x8x4xf32> to vector<8x4xf32>
    %cst_46 = arith.constant dense<0.000000e+00> : vector<8x256xf32>
    %80 = tpu.matmul %79, %77, %cst_46 {dimension_numbers = #tpu.dot_dimension_numbers<[1], [0], [0], [1], [0, 0, 1, 1], [], []>} : vector<8x4xf32>, vector<4x256xf32>, vector<8x256xf32> -> vector<8x256xf32>
    %81 = arith.addf %70, %80 : vector<8x256xf32>
    %82 = vector.extract_strided_slice %1 {offsets = [0, 17], sizes = [4, 239], strides = [1, 1]} : vector<4x256xf32> to vector<4x239xf32>
    %83 = vector.extract_strided_slice %1 {offsets = [0, 0], sizes = [4, 17], strides = [1, 1]} : vector<4x256xf32> to vector<4x17xf32>
    %84 = tpu.concatenate %82, %83 in 1 : vector<4x239xf32>, vector<4x17xf32> -> vector<4x256xf32>
    %c8 = arith.constant 8 : index
    %c0_47 = arith.constant 0 : index
    %c0_48 = arith.constant 0 : index
    %85 = vector.load %arg3[%c8, %c0_47, %c0_48] : memref<9x1x256xf32, #tpu.memory_space<vmem>>, vector<1x1x256xf32>
    %86 = vector.shape_cast %85 : vector<1x1x256xf32> to vector<1x256xf32>
    %87 = vector.broadcast %86 : vector<1x256xf32> to vector<4x256xf32>
    %88 = arith.mulf %84, %87 : vector<4x256xf32>
    %c8_49 = arith.constant 8 : index
    %c0_50 = arith.constant 0 : index
    %c0_51 = arith.constant 0 : index
    %89 = vector.load %arg2[%c8_49, %c0_50, %c0_51] : memref<9x8x4xf32, #tpu.memory_space<vmem>>, vector<1x8x4xf32>
    %90 = vector.shape_cast %89 : vector<1x8x4xf32> to vector<8x4xf32>
    %cst_52 = arith.constant dense<0.000000e+00> : vector<8x256xf32>
    %91 = tpu.matmul %90, %88, %cst_52 {dimension_numbers = #tpu.dot_dimension_numbers<[1], [0], [0], [1], [0, 0, 1, 1], [], []>} : vector<8x4xf32>, vector<4x256xf32>, vector<8x256xf32> -> vector<8x256xf32>
    %92 = arith.addf %81, %91 : vector<8x256xf32>
    %c0_53 = arith.constant 0 : index
    %c0_54 = arith.constant 0 : index
    %c0_55 = arith.constant 0 : index
    %93 = vector.load %arg6[%c0_53, %c0_54, %c0_55] : memref<1x8x256xf32, #tpu.memory_space<vmem>>, vector<1x8x256xf32>
    %94 = vector.shape_cast %93 : vector<1x8x256xf32> to vector<8x256xf32>
    %95 = vector.shape_cast %92 : vector<8x256xf32> to vector<1x8x256xf32>
    tpu.vector_store %arg6[%c0_53, %c0_54, %c0_55], %95 {strides = array<i32>} : memref<1x8x256xf32, #tpu.memory_space<vmem>>, vector<1x8x256xf32>,
    %cst_56 = arith.constant dense<0.000000e+00> : vector<8xf32>
    %96 = vector.multi_reduction <add>, %92, %cst_56 [1] : vector<8x256xf32> to vector<8xf32>
    %97 = vector.shape_cast %96 : vector<8xf32> to vector<8x1xf32>
    %c0_57 = arith.constant 0 : index
    %c0_58 = arith.constant 0 : index
    %c0_59 = arith.constant 0 : index
    %98 = vector.load %arg7[%c0_57, %c0_58, %c0_59] : memref<1x8x1xf32, #tpu.memory_space<vmem>>, vector<1x8x1xf32>
    %99 = vector.shape_cast %98 : vector<1x8x1xf32> to vector<8x1xf32>
    %100 = vector.shape_cast %97 : vector<8x1xf32> to vector<1x8x1xf32>
    tpu.vector_store %arg7[%c0_57, %c0_58, %c0_59], %100 {strides = array<i32>} : memref<1x8x1xf32, #tpu.memory_space<vmem>>, vector<1x8x1xf32>,
    %101 = arith.mulf %92, %92 : vector<8x256xf32>
    %cst_60 = arith.constant dense<0.000000e+00> : vector<8xf32>
    %102 = vector.multi_reduction <add>, %101, %cst_60 [1] : vector<8x256xf32> to vector<8xf32>
    %103 = vector.shape_cast %102 : vector<8xf32> to vector<8x1xf32>
    %c0_61 = arith.constant 0 : index
    %c0_62 = arith.constant 0 : index
    %c0_63 = arith.constant 0 : index
    %104 = vector.load %arg8[%c0_61, %c0_62, %c0_63] : memref<1x8x1xf32, #tpu.memory_space<vmem>>, vector<1x8x1xf32>
    %105 = vector.shape_cast %104 : vector<1x8x1xf32> to vector<8x1xf32>
    %106 = vector.shape_cast %103 : vector<8x1xf32> to vector<1x8x1xf32>
    tpu.vector_store %arg8[%c0_61, %c0_62, %c0_63], %106 {strides = array<i32>} : memref<1x8x1xf32, #tpu.memory_space<vmem>>, vector<1x8x1xf32>,
    return
  }
  func.func @transform_0(%arg0: i32) -> (i32, i32, i32) {
    %c0_i32 = arith.constant 0 : i32
    %c0_i32_0 = arith.constant 0 : i32
    %c0_i32_1 = arith.constant 0 : i32
    return %arg0, %c0_i32, %c0_i32_0 : i32, i32, i32
  }
  func.func @transform_1(%arg0: i32) -> (i32, i32, i32) {
    %c0_i32 = arith.constant 0 : i32
    %c0_i32_0 = arith.constant 0 : i32
    %c0_i32_1 = arith.constant 0 : i32
    %c0_i32_2 = arith.constant 0 : i32
    return %c0_i32, %c0_i32_0, %c0_i32_1 : i32, i32, i32
  }
  func.func @transform_2(%arg0: i32) -> (i32, i32, i32) {
    %c0_i32 = arith.constant 0 : i32
    %c0_i32_0 = arith.constant 0 : i32
    %c0_i32_1 = arith.constant 0 : i32
    %c0_i32_2 = arith.constant 0 : i32
    return %c0_i32, %c0_i32_0, %c0_i32_1 : i32, i32, i32
  }
  func.func @transform_3(%arg0: i32) -> (i32, i32) {
    %c0_i32 = arith.constant 0 : i32
    %c0_i32_0 = arith.constant 0 : i32
    %c0_i32_1 = arith.constant 0 : i32
    return %c0_i32, %c0_i32_0 : i32, i32
  }
  func.func @transform_4(%arg0: i32) -> (i32, i32) {
    %c0_i32 = arith.constant 0 : i32
    %c0_i32_0 = arith.constant 0 : i32
    %c0_i32_1 = arith.constant 0 : i32
    return %c0_i32, %c0_i32_0 : i32, i32
  }
  func.func @transform_5(%arg0: i32) -> (i32, i32, i32) {
    %c0_i32 = arith.constant 0 : i32
    %c0_i32_0 = arith.constant 0 : i32
    %c0_i32_1 = arith.constant 0 : i32
    return %arg0, %c0_i32, %c0_i32_0 : i32, i32, i32
  }
  func.func @transform_6(%arg0: i32) -> (i32, i32, i32) {
    %c0_i32 = arith.constant 0 : i32
    %c0_i32_0 = arith.constant 0 : i32
    %c0_i32_1 = arith.constant 0 : i32
    return %arg0, %c0_i32, %c0_i32_0 : i32, i32, i32
  }
  func.func @transform_7(%arg0: i32) -> (i32, i32, i32) {
    %c0_i32 = arith.constant 0 : i32
    %c0_i32_0 = arith.constant 0 : i32
    %c0_i32_1 = arith.constant 0 : i32
    return %arg0, %c0_i32, %c0_i32_0 : i32, i32, i32
  }
}

module attributes {stable_mosaic.version = 11 : i64} {
  func.func @_bn_relu_kernel(%arg0: i32, %arg1: memref<1x8x256xf32, #tpu.memory_space<vmem>>, %arg2: memref<8x1xf32, #tpu.memory_space<vmem>>, %arg3: memref<8x1xf32, #tpu.memory_space<vmem>>, %arg4: memref<1x8x256xf32, #tpu.memory_space<vmem>>) attributes {dimension_semantics = [#tpu.dimension_semantics<parallel>], iteration_bounds = array<i64: 2>, scalar_prefetch = 0 : i64, scratch_operands = 0 : i64, tpu.core_type = #tpu.core_type<tc>, window_params = [{transform_indices = @transform_0, window_bounds = array<i64: 1, 8, 256>}, {pipeline_mode = #tpu.pipeline_mode<synchronous>, transform_indices = @transform_1, window_bounds = array<i64: 8, 1>}, {pipeline_mode = #tpu.pipeline_mode<synchronous>, transform_indices = @transform_2, window_bounds = array<i64: 8, 1>}, {transform_indices = @transform_3, window_bounds = array<i64: 1, 8, 256>}]} {
    %c0 = arith.constant 0 : index
    %c0_0 = arith.constant 0 : index
    %c0_1 = arith.constant 0 : index
    %0 = vector.load %arg1[%c0, %c0_0, %c0_1] : memref<1x8x256xf32, #tpu.memory_space<vmem>>, vector<1x8x256xf32>
    %1 = vector.shape_cast %0 : vector<1x8x256xf32> to vector<8x256xf32>
    %c0_2 = arith.constant 0 : index
    %c0_3 = arith.constant 0 : index
    %2 = vector.load %arg2[%c0_2, %c0_3] : memref<8x1xf32, #tpu.memory_space<vmem>>, vector<8x1xf32>
    %3 = vector.broadcast %2 : vector<8x1xf32> to vector<8x256xf32>
    %4 = arith.mulf %1, %3 : vector<8x256xf32>
    %c0_4 = arith.constant 0 : index
    %c0_5 = arith.constant 0 : index
    %5 = vector.load %arg3[%c0_4, %c0_5] : memref<8x1xf32, #tpu.memory_space<vmem>>, vector<8x1xf32>
    %6 = vector.broadcast %5 : vector<8x1xf32> to vector<8x256xf32>
    %7 = arith.addf %4, %6 : vector<8x256xf32>
    %cst = arith.constant 0.000000e+00 : f32
    %8 = vector.broadcast %cst : f32 to vector<8x256xf32>
    %9 = arith.maximumf %7, %8 : vector<8x256xf32>
    %c0_6 = arith.constant 0 : index
    %c0_7 = arith.constant 0 : index
    %c0_8 = arith.constant 0 : index
    %10 = vector.load %arg4[%c0_6, %c0_7, %c0_8] : memref<1x8x256xf32, #tpu.memory_space<vmem>>, vector<1x8x256xf32>
    %11 = vector.shape_cast %10 : vector<1x8x256xf32> to vector<8x256xf32>
    %12 = vector.shape_cast %9 : vector<8x256xf32> to vector<1x8x256xf32>
    tpu.vector_store %arg4[%c0_6, %c0_7, %c0_8], %12 {strides = array<i32>} : memref<1x8x256xf32, #tpu.memory_space<vmem>>, vector<1x8x256xf32>,
    return
  }
  func.func @transform_0(%arg0: i32) -> (i32, i32, i32) {
    %c0_i32 = arith.constant 0 : i32
    %c0_i32_0 = arith.constant 0 : i32
    %c0_i32_1 = arith.constant 0 : i32
    return %arg0, %c0_i32, %c0_i32_0 : i32, i32, i32
  }
  func.func @transform_1(%arg0: i32) -> (i32, i32) {
    %c0_i32 = arith.constant 0 : i32
    %c0_i32_0 = arith.constant 0 : i32
    %c0_i32_1 = arith.constant 0 : i32
    return %c0_i32, %c0_i32_0 : i32, i32
  }
  func.func @transform_2(%arg0: i32) -> (i32, i32) {
    %c0_i32 = arith.constant 0 : i32
    %c0_i32_0 = arith.constant 0 : i32
    %c0_i32_1 = arith.constant 0 : i32
    return %c0_i32, %c0_i32_0 : i32, i32
  }
  func.func @transform_3(%arg0: i32) -> (i32, i32, i32) {
    %c0_i32 = arith.constant 0 : i32
    %c0_i32_0 = arith.constant 0 : i32
    %c0_i32_1 = arith.constant 0 : i32
    return %arg0, %c0_i32, %c0_i32_0 : i32, i32, i32
  }
}

module attributes {stable_mosaic.version = 11 : i64} {
  func.func @_conv3x3_bn_stats_kernel(%arg0: i32, %arg1: memref<1x8x256xf32, #tpu.memory_space<vmem>>, %arg2: memref<9x8x8xf32, #tpu.memory_space<vmem>>, %arg3: memref<9x1x256xf32, #tpu.memory_space<vmem>>, %arg4: memref<8x1xf32, #tpu.memory_space<vmem>>, %arg5: memref<8x1xf32, #tpu.memory_space<vmem>>, %arg6: memref<1x8x256xf32, #tpu.memory_space<vmem>>, %arg7: memref<1x8x1xf32, #tpu.memory_space<vmem>>, %arg8: memref<1x8x1xf32, #tpu.memory_space<vmem>>) attributes {dimension_semantics = [#tpu.dimension_semantics<parallel>], iteration_bounds = array<i64: 2>, scalar_prefetch = 0 : i64, scratch_operands = 0 : i64, tpu.core_type = #tpu.core_type<tc>, window_params = [{transform_indices = @transform_0, window_bounds = array<i64: 1, 8, 256>}, {pipeline_mode = #tpu.pipeline_mode<synchronous>, transform_indices = @transform_1, window_bounds = array<i64: 9, 8, 8>}, {pipeline_mode = #tpu.pipeline_mode<synchronous>, transform_indices = @transform_2, window_bounds = array<i64: 9, 1, 256>}, {pipeline_mode = #tpu.pipeline_mode<synchronous>, transform_indices = @transform_3, window_bounds = array<i64: 8, 1>}, {pipeline_mode = #tpu.pipeline_mode<synchronous>, transform_indices = @transform_4, window_bounds = array<i64: 8, 1>}, {transform_indices = @transform_5, window_bounds = array<i64: 1, 8, 256>}, {transform_indices = @transform_6, window_bounds = array<i64: 1, 8, 1>}, {transform_indices = @transform_7, window_bounds = array<i64: 1, 8, 1>}]} {
    %c0 = arith.constant 0 : index
    %c0_0 = arith.constant 0 : index
    %c0_1 = arith.constant 0 : index
    %0 = vector.load %arg1[%c0, %c0_0, %c0_1] : memref<1x8x256xf32, #tpu.memory_space<vmem>>, vector<1x8x256xf32>
    %1 = vector.shape_cast %0 : vector<1x8x256xf32> to vector<8x256xf32>
    %c0_2 = arith.constant 0 : index
    %c0_3 = arith.constant 0 : index
    %2 = vector.load %arg4[%c0_2, %c0_3] : memref<8x1xf32, #tpu.memory_space<vmem>>, vector<8x1xf32>
    %3 = vector.broadcast %2 : vector<8x1xf32> to vector<8x256xf32>
    %4 = arith.mulf %1, %3 : vector<8x256xf32>
    %c0_4 = arith.constant 0 : index
    %c0_5 = arith.constant 0 : index
    %5 = vector.load %arg5[%c0_4, %c0_5] : memref<8x1xf32, #tpu.memory_space<vmem>>, vector<8x1xf32>
    %6 = vector.broadcast %5 : vector<8x1xf32> to vector<8x256xf32>
    %7 = arith.addf %4, %6 : vector<8x256xf32>
    %cst = arith.constant 0.000000e+00 : f32
    %8 = vector.broadcast %cst : f32 to vector<8x256xf32>
    %9 = arith.maximumf %7, %8 : vector<8x256xf32>
    %10 = vector.extract_strided_slice %9 {offsets = [0, 239], sizes = [8, 17], strides = [1, 1]} : vector<8x256xf32> to vector<8x17xf32>
    %11 = vector.extract_strided_slice %9 {offsets = [0, 0], sizes = [8, 239], strides = [1, 1]} : vector<8x256xf32> to vector<8x239xf32>
    %12 = tpu.concatenate %10, %11 in 1 : vector<8x17xf32>, vector<8x239xf32> -> vector<8x256xf32>
    %c0_6 = arith.constant 0 : index
    %c0_7 = arith.constant 0 : index
    %c0_8 = arith.constant 0 : index
    %13 = vector.load %arg3[%c0_6, %c0_7, %c0_8] : memref<9x1x256xf32, #tpu.memory_space<vmem>>, vector<1x1x256xf32>
    %14 = vector.shape_cast %13 : vector<1x1x256xf32> to vector<1x256xf32>
    %15 = vector.broadcast %14 : vector<1x256xf32> to vector<8x256xf32>
    %16 = arith.mulf %12, %15 : vector<8x256xf32>
    %c0_9 = arith.constant 0 : index
    %c0_10 = arith.constant 0 : index
    %c0_11 = arith.constant 0 : index
    %17 = vector.load %arg2[%c0_9, %c0_10, %c0_11] : memref<9x8x8xf32, #tpu.memory_space<vmem>>, vector<1x8x8xf32>
    %18 = vector.shape_cast %17 : vector<1x8x8xf32> to vector<8x8xf32>
    %cst_12 = arith.constant dense<0.000000e+00> : vector<8x256xf32>
    %19 = tpu.matmul %18, %16, %cst_12 {dimension_numbers = #tpu.dot_dimension_numbers<[1], [0], [0], [1], [0, 0, 1, 1], [], []>} : vector<8x8xf32>, vector<8x256xf32>, vector<8x256xf32> -> vector<8x256xf32>
    %20 = vector.extract_strided_slice %9 {offsets = [0, 240], sizes = [8, 16], strides = [1, 1]} : vector<8x256xf32> to vector<8x16xf32>
    %21 = vector.extract_strided_slice %9 {offsets = [0, 0], sizes = [8, 240], strides = [1, 1]} : vector<8x256xf32> to vector<8x240xf32>
    %22 = tpu.concatenate %20, %21 in 1 : vector<8x16xf32>, vector<8x240xf32> -> vector<8x256xf32>
    %c1 = arith.constant 1 : index
    %c0_13 = arith.constant 0 : index
    %c0_14 = arith.constant 0 : index
    %23 = vector.load %arg3[%c1, %c0_13, %c0_14] : memref<9x1x256xf32, #tpu.memory_space<vmem>>, vector<1x1x256xf32>
    %24 = vector.shape_cast %23 : vector<1x1x256xf32> to vector<1x256xf32>
    %25 = vector.broadcast %24 : vector<1x256xf32> to vector<8x256xf32>
    %26 = arith.mulf %22, %25 : vector<8x256xf32>
    %c1_15 = arith.constant 1 : index
    %c0_16 = arith.constant 0 : index
    %c0_17 = arith.constant 0 : index
    %27 = vector.load %arg2[%c1_15, %c0_16, %c0_17] : memref<9x8x8xf32, #tpu.memory_space<vmem>>, vector<1x8x8xf32>
    %28 = vector.shape_cast %27 : vector<1x8x8xf32> to vector<8x8xf32>
    %cst_18 = arith.constant dense<0.000000e+00> : vector<8x256xf32>
    %29 = tpu.matmul %28, %26, %cst_18 {dimension_numbers = #tpu.dot_dimension_numbers<[1], [0], [0], [1], [0, 0, 1, 1], [], []>} : vector<8x8xf32>, vector<8x256xf32>, vector<8x256xf32> -> vector<8x256xf32>
    %30 = arith.addf %19, %29 : vector<8x256xf32>
    %31 = vector.extract_strided_slice %9 {offsets = [0, 241], sizes = [8, 15], strides = [1, 1]} : vector<8x256xf32> to vector<8x15xf32>
    %32 = vector.extract_strided_slice %9 {offsets = [0, 0], sizes = [8, 241], strides = [1, 1]} : vector<8x256xf32> to vector<8x241xf32>
    %33 = tpu.concatenate %31, %32 in 1 : vector<8x15xf32>, vector<8x241xf32> -> vector<8x256xf32>
    %c2 = arith.constant 2 : index
    %c0_19 = arith.constant 0 : index
    %c0_20 = arith.constant 0 : index
    %34 = vector.load %arg3[%c2, %c0_19, %c0_20] : memref<9x1x256xf32, #tpu.memory_space<vmem>>, vector<1x1x256xf32>
    %35 = vector.shape_cast %34 : vector<1x1x256xf32> to vector<1x256xf32>
    %36 = vector.broadcast %35 : vector<1x256xf32> to vector<8x256xf32>
    %37 = arith.mulf %33, %36 : vector<8x256xf32>
    %c2_21 = arith.constant 2 : index
    %c0_22 = arith.constant 0 : index
    %c0_23 = arith.constant 0 : index
    %38 = vector.load %arg2[%c2_21, %c0_22, %c0_23] : memref<9x8x8xf32, #tpu.memory_space<vmem>>, vector<1x8x8xf32>
    %39 = vector.shape_cast %38 : vector<1x8x8xf32> to vector<8x8xf32>
    %cst_24 = arith.constant dense<0.000000e+00> : vector<8x256xf32>
    %40 = tpu.matmul %39, %37, %cst_24 {dimension_numbers = #tpu.dot_dimension_numbers<[1], [0], [0], [1], [0, 0, 1, 1], [], []>} : vector<8x8xf32>, vector<8x256xf32>, vector<8x256xf32> -> vector<8x256xf32>
    %41 = arith.addf %30, %40 : vector<8x256xf32>
    %42 = vector.extract_strided_slice %9 {offsets = [0, 255], sizes = [8, 1], strides = [1, 1]} : vector<8x256xf32> to vector<8x1xf32>
    %43 = vector.extract_strided_slice %9 {offsets = [0, 0], sizes = [8, 255], strides = [1, 1]} : vector<8x256xf32> to vector<8x255xf32>
    %44 = tpu.concatenate %42, %43 in 1 : vector<8x1xf32>, vector<8x255xf32> -> vector<8x256xf32>
    %c3 = arith.constant 3 : index
    %c0_25 = arith.constant 0 : index
    %c0_26 = arith.constant 0 : index
    %45 = vector.load %arg3[%c3, %c0_25, %c0_26] : memref<9x1x256xf32, #tpu.memory_space<vmem>>, vector<1x1x256xf32>
    %46 = vector.shape_cast %45 : vector<1x1x256xf32> to vector<1x256xf32>
    %47 = vector.broadcast %46 : vector<1x256xf32> to vector<8x256xf32>
    %48 = arith.mulf %44, %47 : vector<8x256xf32>
    %c3_27 = arith.constant 3 : index
    %c0_28 = arith.constant 0 : index
    %c0_29 = arith.constant 0 : index
    %49 = vector.load %arg2[%c3_27, %c0_28, %c0_29] : memref<9x8x8xf32, #tpu.memory_space<vmem>>, vector<1x8x8xf32>
    %50 = vector.shape_cast %49 : vector<1x8x8xf32> to vector<8x8xf32>
    %cst_30 = arith.constant dense<0.000000e+00> : vector<8x256xf32>
    %51 = tpu.matmul %50, %48, %cst_30 {dimension_numbers = #tpu.dot_dimension_numbers<[1], [0], [0], [1], [0, 0, 1, 1], [], []>} : vector<8x8xf32>, vector<8x256xf32>, vector<8x256xf32> -> vector<8x256xf32>
    %52 = arith.addf %41, %51 : vector<8x256xf32>
    %c4 = arith.constant 4 : index
    %c0_31 = arith.constant 0 : index
    %c0_32 = arith.constant 0 : index
    %53 = vector.load %arg2[%c4, %c0_31, %c0_32] : memref<9x8x8xf32, #tpu.memory_space<vmem>>, vector<1x8x8xf32>
    %54 = vector.shape_cast %53 : vector<1x8x8xf32> to vector<8x8xf32>
    %cst_33 = arith.constant dense<0.000000e+00> : vector<8x256xf32>
    %55 = tpu.matmul %54, %9, %cst_33 {dimension_numbers = #tpu.dot_dimension_numbers<[1], [0], [0], [1], [0, 0, 1, 1], [], []>} : vector<8x8xf32>, vector<8x256xf32>, vector<8x256xf32> -> vector<8x256xf32>
    %56 = arith.addf %52, %55 : vector<8x256xf32>
    %57 = vector.extract_strided_slice %9 {offsets = [0, 1], sizes = [8, 255], strides = [1, 1]} : vector<8x256xf32> to vector<8x255xf32>
    %58 = vector.extract_strided_slice %9 {offsets = [0, 0], sizes = [8, 1], strides = [1, 1]} : vector<8x256xf32> to vector<8x1xf32>
    %59 = tpu.concatenate %57, %58 in 1 : vector<8x255xf32>, vector<8x1xf32> -> vector<8x256xf32>
    %c5 = arith.constant 5 : index
    %c0_34 = arith.constant 0 : index
    %c0_35 = arith.constant 0 : index
    %60 = vector.load %arg3[%c5, %c0_34, %c0_35] : memref<9x1x256xf32, #tpu.memory_space<vmem>>, vector<1x1x256xf32>
    %61 = vector.shape_cast %60 : vector<1x1x256xf32> to vector<1x256xf32>
    %62 = vector.broadcast %61 : vector<1x256xf32> to vector<8x256xf32>
    %63 = arith.mulf %59, %62 : vector<8x256xf32>
    %c5_36 = arith.constant 5 : index
    %c0_37 = arith.constant 0 : index
    %c0_38 = arith.constant 0 : index
    %64 = vector.load %arg2[%c5_36, %c0_37, %c0_38] : memref<9x8x8xf32, #tpu.memory_space<vmem>>, vector<1x8x8xf32>
    %65 = vector.shape_cast %64 : vector<1x8x8xf32> to vector<8x8xf32>
    %cst_39 = arith.constant dense<0.000000e+00> : vector<8x256xf32>
    %66 = tpu.matmul %65, %63, %cst_39 {dimension_numbers = #tpu.dot_dimension_numbers<[1], [0], [0], [1], [0, 0, 1, 1], [], []>} : vector<8x8xf32>, vector<8x256xf32>, vector<8x256xf32> -> vector<8x256xf32>
    %67 = arith.addf %56, %66 : vector<8x256xf32>
    %68 = vector.extract_strided_slice %9 {offsets = [0, 15], sizes = [8, 241], strides = [1, 1]} : vector<8x256xf32> to vector<8x241xf32>
    %69 = vector.extract_strided_slice %9 {offsets = [0, 0], sizes = [8, 15], strides = [1, 1]} : vector<8x256xf32> to vector<8x15xf32>
    %70 = tpu.concatenate %68, %69 in 1 : vector<8x241xf32>, vector<8x15xf32> -> vector<8x256xf32>
    %c6 = arith.constant 6 : index
    %c0_40 = arith.constant 0 : index
    %c0_41 = arith.constant 0 : index
    %71 = vector.load %arg3[%c6, %c0_40, %c0_41] : memref<9x1x256xf32, #tpu.memory_space<vmem>>, vector<1x1x256xf32>
    %72 = vector.shape_cast %71 : vector<1x1x256xf32> to vector<1x256xf32>
    %73 = vector.broadcast %72 : vector<1x256xf32> to vector<8x256xf32>
    %74 = arith.mulf %70, %73 : vector<8x256xf32>
    %c6_42 = arith.constant 6 : index
    %c0_43 = arith.constant 0 : index
    %c0_44 = arith.constant 0 : index
    %75 = vector.load %arg2[%c6_42, %c0_43, %c0_44] : memref<9x8x8xf32, #tpu.memory_space<vmem>>, vector<1x8x8xf32>
    %76 = vector.shape_cast %75 : vector<1x8x8xf32> to vector<8x8xf32>
    %cst_45 = arith.constant dense<0.000000e+00> : vector<8x256xf32>
    %77 = tpu.matmul %76, %74, %cst_45 {dimension_numbers = #tpu.dot_dimension_numbers<[1], [0], [0], [1], [0, 0, 1, 1], [], []>} : vector<8x8xf32>, vector<8x256xf32>, vector<8x256xf32> -> vector<8x256xf32>
    %78 = arith.addf %67, %77 : vector<8x256xf32>
    %79 = vector.extract_strided_slice %9 {offsets = [0, 16], sizes = [8, 240], strides = [1, 1]} : vector<8x256xf32> to vector<8x240xf32>
    %80 = vector.extract_strided_slice %9 {offsets = [0, 0], sizes = [8, 16], strides = [1, 1]} : vector<8x256xf32> to vector<8x16xf32>
    %81 = tpu.concatenate %79, %80 in 1 : vector<8x240xf32>, vector<8x16xf32> -> vector<8x256xf32>
    %c7 = arith.constant 7 : index
    %c0_46 = arith.constant 0 : index
    %c0_47 = arith.constant 0 : index
    %82 = vector.load %arg3[%c7, %c0_46, %c0_47] : memref<9x1x256xf32, #tpu.memory_space<vmem>>, vector<1x1x256xf32>
    %83 = vector.shape_cast %82 : vector<1x1x256xf32> to vector<1x256xf32>
    %84 = vector.broadcast %83 : vector<1x256xf32> to vector<8x256xf32>
    %85 = arith.mulf %81, %84 : vector<8x256xf32>
    %c7_48 = arith.constant 7 : index
    %c0_49 = arith.constant 0 : index
    %c0_50 = arith.constant 0 : index
    %86 = vector.load %arg2[%c7_48, %c0_49, %c0_50] : memref<9x8x8xf32, #tpu.memory_space<vmem>>, vector<1x8x8xf32>
    %87 = vector.shape_cast %86 : vector<1x8x8xf32> to vector<8x8xf32>
    %cst_51 = arith.constant dense<0.000000e+00> : vector<8x256xf32>
    %88 = tpu.matmul %87, %85, %cst_51 {dimension_numbers = #tpu.dot_dimension_numbers<[1], [0], [0], [1], [0, 0, 1, 1], [], []>} : vector<8x8xf32>, vector<8x256xf32>, vector<8x256xf32> -> vector<8x256xf32>
    %89 = arith.addf %78, %88 : vector<8x256xf32>
    %90 = vector.extract_strided_slice %9 {offsets = [0, 17], sizes = [8, 239], strides = [1, 1]} : vector<8x256xf32> to vector<8x239xf32>
    %91 = vector.extract_strided_slice %9 {offsets = [0, 0], sizes = [8, 17], strides = [1, 1]} : vector<8x256xf32> to vector<8x17xf32>
    %92 = tpu.concatenate %90, %91 in 1 : vector<8x239xf32>, vector<8x17xf32> -> vector<8x256xf32>
    %c8 = arith.constant 8 : index
    %c0_52 = arith.constant 0 : index
    %c0_53 = arith.constant 0 : index
    %93 = vector.load %arg3[%c8, %c0_52, %c0_53] : memref<9x1x256xf32, #tpu.memory_space<vmem>>, vector<1x1x256xf32>
    %94 = vector.shape_cast %93 : vector<1x1x256xf32> to vector<1x256xf32>
    %95 = vector.broadcast %94 : vector<1x256xf32> to vector<8x256xf32>
    %96 = arith.mulf %92, %95 : vector<8x256xf32>
    %c8_54 = arith.constant 8 : index
    %c0_55 = arith.constant 0 : index
    %c0_56 = arith.constant 0 : index
    %97 = vector.load %arg2[%c8_54, %c0_55, %c0_56] : memref<9x8x8xf32, #tpu.memory_space<vmem>>, vector<1x8x8xf32>
    %98 = vector.shape_cast %97 : vector<1x8x8xf32> to vector<8x8xf32>
    %cst_57 = arith.constant dense<0.000000e+00> : vector<8x256xf32>
    %99 = tpu.matmul %98, %96, %cst_57 {dimension_numbers = #tpu.dot_dimension_numbers<[1], [0], [0], [1], [0, 0, 1, 1], [], []>} : vector<8x8xf32>, vector<8x256xf32>, vector<8x256xf32> -> vector<8x256xf32>
    %100 = arith.addf %89, %99 : vector<8x256xf32>
    %c0_58 = arith.constant 0 : index
    %c0_59 = arith.constant 0 : index
    %c0_60 = arith.constant 0 : index
    %101 = vector.load %arg6[%c0_58, %c0_59, %c0_60] : memref<1x8x256xf32, #tpu.memory_space<vmem>>, vector<1x8x256xf32>
    %102 = vector.shape_cast %101 : vector<1x8x256xf32> to vector<8x256xf32>
    %103 = vector.shape_cast %100 : vector<8x256xf32> to vector<1x8x256xf32>
    tpu.vector_store %arg6[%c0_58, %c0_59, %c0_60], %103 {strides = array<i32>} : memref<1x8x256xf32, #tpu.memory_space<vmem>>, vector<1x8x256xf32>,
    %cst_61 = arith.constant dense<0.000000e+00> : vector<8xf32>
    %104 = vector.multi_reduction <add>, %100, %cst_61 [1] : vector<8x256xf32> to vector<8xf32>
    %105 = vector.shape_cast %104 : vector<8xf32> to vector<8x1xf32>
    %c0_62 = arith.constant 0 : index
    %c0_63 = arith.constant 0 : index
    %c0_64 = arith.constant 0 : index
    %106 = vector.load %arg7[%c0_62, %c0_63, %c0_64] : memref<1x8x1xf32, #tpu.memory_space<vmem>>, vector<1x8x1xf32>
    %107 = vector.shape_cast %106 : vector<1x8x1xf32> to vector<8x1xf32>
    %108 = vector.shape_cast %105 : vector<8x1xf32> to vector<1x8x1xf32>
    tpu.vector_store %arg7[%c0_62, %c0_63, %c0_64], %108 {strides = array<i32>} : memref<1x8x1xf32, #tpu.memory_space<vmem>>, vector<1x8x1xf32>,
    %109 = arith.mulf %100, %100 : vector<8x256xf32>
    %cst_65 = arith.constant dense<0.000000e+00> : vector<8xf32>
    %110 = vector.multi_reduction <add>, %109, %cst_65 [1] : vector<8x256xf32> to vector<8xf32>
    %111 = vector.shape_cast %110 : vector<8xf32> to vector<8x1xf32>
    %c0_66 = arith.constant 0 : index
    %c0_67 = arith.constant 0 : index
    %c0_68 = arith.constant 0 : index
    %112 = vector.load %arg8[%c0_66, %c0_67, %c0_68] : memref<1x8x1xf32, #tpu.memory_space<vmem>>, vector<1x8x1xf32>
    %113 = vector.shape_cast %112 : vector<1x8x1xf32> to vector<8x1xf32>
    %114 = vector.shape_cast %111 : vector<8x1xf32> to vector<1x8x1xf32>
    tpu.vector_store %arg8[%c0_66, %c0_67, %c0_68], %114 {strides = array<i32>} : memref<1x8x1xf32, #tpu.memory_space<vmem>>, vector<1x8x1xf32>,
    return
  }
  func.func @transform_0(%arg0: i32) -> (i32, i32, i32) {
    %c0_i32 = arith.constant 0 : i32
    %c0_i32_0 = arith.constant 0 : i32
    %c0_i32_1 = arith.constant 0 : i32
    return %arg0, %c0_i32, %c0_i32_0 : i32, i32, i32
  }
  func.func @transform_1(%arg0: i32) -> (i32, i32, i32) {
    %c0_i32 = arith.constant 0 : i32
    %c0_i32_0 = arith.constant 0 : i32
    %c0_i32_1 = arith.constant 0 : i32
    %c0_i32_2 = arith.constant 0 : i32
    return %c0_i32, %c0_i32_0, %c0_i32_1 : i32, i32, i32
  }
  func.func @transform_2(%arg0: i32) -> (i32, i32, i32) {
    %c0_i32 = arith.constant 0 : i32
    %c0_i32_0 = arith.constant 0 : i32
    %c0_i32_1 = arith.constant 0 : i32
    %c0_i32_2 = arith.constant 0 : i32
    return %c0_i32, %c0_i32_0, %c0_i32_1 : i32, i32, i32
  }
  func.func @transform_3(%arg0: i32) -> (i32, i32) {
    %c0_i32 = arith.constant 0 : i32
    %c0_i32_0 = arith.constant 0 : i32
    %c0_i32_1 = arith.constant 0 : i32
    return %c0_i32, %c0_i32_0 : i32, i32
  }
  func.func @transform_4(%arg0: i32) -> (i32, i32) {
    %c0_i32 = arith.constant 0 : i32
    %c0_i32_0 = arith.constant 0 : i32
    %c0_i32_1 = arith.constant 0 : i32
    return %c0_i32, %c0_i32_0 : i32, i32
  }
  func.func @transform_5(%arg0: i32) -> (i32, i32, i32) {
    %c0_i32 = arith.constant 0 : i32
    %c0_i32_0 = arith.constant 0 : i32
    %c0_i32_1 = arith.constant 0 : i32
    return %arg0, %c0_i32, %c0_i32_0 : i32, i32, i32
  }
  func.func @transform_6(%arg0: i32) -> (i32, i32, i32) {
    %c0_i32 = arith.constant 0 : i32
    %c0_i32_0 = arith.constant 0 : i32
    %c0_i32_1 = arith.constant 0 : i32
    return %arg0, %c0_i32, %c0_i32_0 : i32, i32, i32
  }
  func.func @transform_7(%arg0: i32) -> (i32, i32, i32) {
    %c0_i32 = arith.constant 0 : i32
    %c0_i32_0 = arith.constant 0 : i32
    %c0_i32_1 = arith.constant 0 : i32
    return %arg0, %c0_i32, %c0_i32_0 : i32, i32, i32
  }
}

</mosaic_0001>

<bundles_post_ra>
// kernel: double_conv.5
= control target key start
LH: loop header
LB: loop body
LE: loop exit
PB: predicated region body
PF: predicated region fallthrough
CT: control target
= control target key end

     0   :  { %s300_s12 = smov 0   ;;  %s323_s0 = inlined_call_operand.vmem [shape: f32[2,8,256], index: 0, kind: input, shape index: {}]   ;;  %s324_s1 = inlined_call_operand.vmem [shape: f32[8,1], index: 1, kind: input, shape index: {}]   ;;  %s325_s2 = inlined_call_operand.vmem [shape: f32[8,1], index: 2, kind: input, shape index: {}]   ;;  %s326_s3 = inlined_call_operand.vmem [shape: f32[2,8,256], index: 3, kind: output, shape index: {}]  }
   0x1 LB: > { %s248_s13 = sadd.s32 4294967295, %s277_s12   ;;  %p252_p0 = scmp.ge.s32.totalorder %s277_s12, 1  ;;  %s277_s12 = sphi %s300_s12, %s13_s12  }
   0x2   : > { %p137_p1 = scmp.lt.s32.totalorder %s277_s12, 3 }
   0x4   : > { %p138_p2 = pnand %p252_p0, %p137_p1 }
   0x5   : > { %v173_v0 = vld [vmem:[%s324_s1] sm:$0xff] (!%p138_p2)  ;;  %v279_v1 = vmov (!%p138_p2), 0   ;;  %p161_p3 = scmp.lt.s32.totalorder (!%p138_p2), %s248_s13, 1 }
   0x6   : > { %141 = sbr.rel (%p138_p2) target bundleno = 144 (0x90), region = 32  ;;  %270 = vset.pattern.permute.xlu0 (!%p138_p2), %v279_v1  ;;  %v181_v2 = vld [vmem:[%s325_s2] sm:$0xff] (!%p138_p2) }
   0x7   : > { %176 = vperm.xlu0 (!%p138_p2), %270, %v173_v0  }
   0xb   : > { %184 = vperm.xlu0 (!%p138_p2), %270, %v181_v2  }
   0xd   : > { %s328_s13 = smov (!%p161_p3, %s248_s13), 1 }
   0xe   : > { %s259_s18 = sshll.u32 %s328_s13, 4 }
   0xf   : > { %s165_s21 = scalar_lea.vmem %s323_s0, %s259_s18  ;;  %s170_s24 = scalar_lea.vmem %s326_s3, %s259_s18 }
  0x10   : > { %v171_v4 = vld [vmem:[%s165_s21] sm:$0xff]  ;;  %v172_v5 = vld [vmem:[%s165_s21 + $0x8] sm:$0xff] }
  0x86   : > { %v177_v3 = vpop.permute.xlu0 %176 }
  0x87   : > { %v179_v6 = vmul.f32 %v177_v3, %v171_v4  ;;  %v180_v7 = vmul.f32 %v177_v3, %v172_v5 }
  0x8a   : > { %v185_v8 = vpop.permute.xlu0 %184 }
  0x8b   : > { %v187_v9 = vadd.f32 %v185_v8, %v179_v6  ;;  %v188_v10 = vadd.f32 %v185_v8, %v180_v7 }
  0x8d   : > { %v189_v11 = vmax.f32 %v187_v9, 0.0  ;;  %v190_v12 = vmax.f32 %v188_v10, 0.0 }
  0x8f   : > { %191 = vst [vmem:[%s170_s24] sm:$0xff] %v189_v11  ;;  %192 = vst [vmem:[%s170_s24 + $0x8] sm:$0xff] %v190_v12 }
  0x90 PF: > { %s13_s12 = sadd.s32 1, %s277_s12  }
  0x91   : > { %p10_p4 = scmp.ge.s32.totalorder %s13_s12, 4  }
  0x93   :  { %12 = sbr.rel (!%p10_p4) target bundleno = 1 (0x1), region = 62 }

// kernel: double_conv.3
= control target key start
LH: loop header
LB: loop body
LE: loop exit
PB: predicated region body
PF: predicated region fallthrough
CT: control target
= control target key end

     0   :  { %s1530_s24 = smov 0   ;;  %s1675_s0 = inlined_call_operand.vmem [shape: f32[2,4,256], index: 0, kind: input, shape index: {}]   ;;  %s1676_s1 = inlined_call_operand.vmem [shape: f32[9,8,4], index: 1, kind: input, shape index: {}]   ;;  %s1677_s2 = inlined_call_operand.vmem [shape: f32[9,1,256], index: 2, kind: input, shape index: {}]   ;;  %s1678_s3 = inlined_call_operand.vmem [shape: f32[4,1], index: 3, kind: input, shape index: {}]   ;;  %s1679_s4 = inlined_call_operand.vmem [shape: f32[4,1], index: 4, kind: input, shape index: {}]   ;;  %s1680_s5 = inlined_call_operand.vmem [shape: f32[2,8,256], index: 5, kind: output, shape index: {0}]   ;;  %s1681_s6 = inlined_call_operand.vmem [shape: f32[2,8,1], index: 6, kind: output, shape index: {1}]   ;;  %s1682_s7 = inlined_call_operand.vmem [shape: f32[2,8,1], index: 7, kind: output, shape index: {2}]  }
   0x1 LB: > { %s1382_s3 = sadd.s32 4294967295, %s1479_s24   ;;  %p1386_p0 = scmp.ge.s32.totalorder %s1479_s24, 1  ;;  %s1479_s24 = sphi %s1530_s24, %s18_s24  }
   0x2   : > { %p242_p1 = scmp.lt.s32.totalorder %s1479_s24, 3 }
   0x4   : > { %p243_p2 = pnand %p1386_p0, %p242_p1 }
   0x5   : > { %p282_p3 = scmp.lt.s32.totalorder (!%p243_p2), %s1382_s3, 1  ;;  %v1481_v0 = vmov (!%p243_p2), 0.0   ;;  %vm359_vm0 = vcmask (!%p243_p2), 1043456   ;;  %s1482_s28 = smov (!%p243_p2), 127   ;;  %vm355_vm1 = vcmask (!%p243_p2), 31744   ;;  %v1411_v3 = vld [vmem:[%s1676_s1 + $0x20] sm:$0xff] (!%p243_p2)  ;;  %v315_v4 = vlaneseq (!%p243_p2) }
   0x6   : > { %246 = sbr.rel (%p243_p2) target bundleno = 527 (0x20f), region = 40  ;;  %808 = vmatprep.mubr.f32.mxu0 (!%p243_p2), %v1481_v0  ;;  %430 = vmatprep.mubr.f32.mxu1 (!%p243_p2), %v1481_v0  ;;  %s1483_s29 = smov (!%p243_p2), 16   ;;  %v1415_v8 = vld [vmem:[%s1677_s2 + $0xa] sm:$0x3] (!%p243_p2)  ;;  %v1393_v9 = vld [vmem:[%s1677_s2 + $0x2] sm:$0x3] (!%p243_p2) }
   0x7   : > { %s1484_s9 = smov (!%p243_p2), 17   ;;  %s1485_s10 = smov (!%p243_p2), 113   ;;  %v316_v5 = vshrl.u32 (!%p243_p2), %v315_v4, 7  ;;  %vm821_vm2 = vcmask (!%p243_p2), 1039360   ;;  %vm333_vm3 = vcmask (!%p243_p2), 130048   ;;  %vm308_vm4 = vcmask (!%p243_p2), 138240  }
   0x8   : > { %s1486_s11 = smov (!%p243_p2), 15   ;;  %s1487_s12 = smov (!%p243_p2), 112   ;;  %v313_v12 = vld [vmem:[%s1677_s2] sm:$0x3] (!%p243_p2)  ;;  %v1420_v29 = vld [vmem:[%s1677_s2 + $0xc] sm:$0x3] (!%p243_p2) }
   0x9   : > { %s1488_s13 = smov (!%p243_p2), 1   ;;  %s1489_s14 = smov (!%p243_p2), 111   ;;  %v1556_v6 = vsub.s32 (!%p243_p2), 0, %v316_v5  ;;  %v1558_v7 = vsub.s32 (!%p243_p2), 1, %v316_v5  ;;  %v1394_v30 = vld [vmem:[%s1676_s1 + $0x8] sm:$0xff] (!%p243_p2)  ;;  %vm930_vm5 = vcmask (!%p243_p2), 924672  }
   0xa   : > { %v1416_v31 = vld [vmem:[%s1676_s1 + $0x28] sm:$0xff] (!%p243_p2)  ;;  %v1401_v40 = vld [vmem:[%s1677_s2 + $0x4] sm:$0x3] (!%p243_p2)  ;;  %vm522_vm6 = vcmask (!%p243_p2), 121856   ;;  %v1421_v51 = vld [vmem:[%s1676_s1 + $0x30] sm:$0xff] (!%p243_p2)  ;;  %vm1039_vm7 = vcmask (!%p243_p2), 916480  }
   0xb   : > { %v833_v13 = vrot.slane (!%p243_p2), %v1415_v8, %v1556_v6  ;;  %v837_v14 = vrot.slane (!%p243_p2), %v1415_v8, %v1558_v7  ;;  %v344_v15 = vrot.slane (!%p243_p2), %v1393_v9, %v1556_v6  ;;  %v348_v16 = vrot.slane (!%p243_p2), %v1393_v9, %v1558_v7  ;;  %v1425_v49 = vld [vmem:[%s1677_s2 + $0xe] sm:$0x3] (!%p243_p2)  ;;  %v327_v50 = vld [vmem:[%s1676_s1] sm:$0xff] (!%p243_p2)  ;;  %v1430_v8 = vld [vmem:[%s1677_s2 + $0x10] sm:$0x3] (!%p243_p2) }
   0xc   : > { %v318_v19 = vrot.slane (!%p243_p2), %v313_v12, %v1556_v6  ;;  %v322_v20 = vrot.slane (!%p243_p2), %v313_v12, %v1558_v7  ;;  %v942_v36 = vrot.slane (!%p243_p2), %v1420_v29, %v1556_v6  ;;  %v946_v39 = vrot.slane (!%p243_p2), %v1420_v29, %v1558_v7  ;;  %v1406_v60 = vld [vmem:[%s1677_s2 + $0x6] sm:$0x3] (!%p243_p2)  ;;  %v1402_v9 = vld [vmem:[%s1676_s1 + $0x10] sm:$0xff] (!%p243_p2) }
   0xd   : > { %s1684_s3 = smov (!%p282_p3, %s1382_s3), 1  ;;  %v533_v47 = vrot.slane %v1401_v40, %v1556_v6  ;;  %v537_v48 = vrot.slane %v1401_v40, %v1558_v7  ;;  %v1051_v56 = vrot.slane %v1425_v49, %v1556_v6  ;;  %v1055_v59 = vrot.slane %v1425_v49, %v1558_v7 }
   0xe   : > { %s1543_s4 = sshll.u32 %s1684_s3, 3  ;;  %vm631_vm8 = vcmask 7168   ;;  %v642_v4 = vrot.slane %v1406_v60, %v1556_v6  ;;  %v646_v5 = vrot.slane %v1406_v60, %v1558_v7  ;;  %vm1148_vm9 = vcmask 908288   ;;  %s1438_s26 = sshll.u32 %s1684_s3, 4 }
   0xf   : > { %s286_s27 = scalar_lea.vmem %s1675_s0, %s1543_s4  ;;  %s295_s8 = scalar_lea.vmem %s1681_s6, %s1543_s4 }
  0x10   : > { %v300_v1 = vld [vmem:[%s286_s27] sm:$0xff] }
  0x11   : > { %817 = vrot.lane.b32.xlu1 %v300_v1, %s1482_s28  ;;  %331 = vrot.lane.b32.xlu0 %v300_v1, %s1483_s29  ;;  %v302_v2 = vcombine.high %v300_v1, %v300_v1 }
  0x13   : > { %1412 = vmatprep.subr.msk.mxu0 %vm359_vm0, %v302_v2 }
  0x14   : > { %1413 = vmatpush1.msk.msra.mxu0 %vm359_vm0, %v300_v1 }
  0x15   : > { %819 = vrot.lane.b32.xlu1 %v302_v2, %s1482_s28  ;;  %328 = vrot.lane.b32.xlu0 %v302_v2, %s1483_s29  ;;  %s291_s29 = scalar_lea.vmem %s1680_s5, %s1438_s26 }
  0x16   : > { %1414 = vmatmul.mubr.msk.f32.vlgmr.msra.gmra.mrb[0].mxu0 %vm355_vm1, %v1411_v3 }
  0x17   : > { %917 = vmatprep.mubr.f32.mxu0 %v1481_v0 }
  0x19   : > { %306 = vrot.lane.b32.xlu1 %v300_v1, %s1484_s9  ;;  %303 = vrot.lane.b32.xlu0 %v302_v2, %s1484_s9 }
  0x1d   : > { %928 = vrot.lane.b32.xlu1 %v302_v2, %s1485_s10  ;;  %926 = vrot.lane.b32.xlu0 %v300_v1, %s1485_s10 }
  0x21   : > { %520 = vrot.lane.b32.xlu1 %v300_v1, %s1486_s11  ;;  %517 = vrot.lane.b32.xlu0 %v302_v2, %s1486_s11  ;;  %s299_s11 = scalar_lea.vmem %s1682_s7, %s1543_s4 }
  0x25   : > { %1037 = vrot.lane.b32.xlu1 %v302_v2, %s1487_s12  ;;  %1035 = vrot.lane.b32.xlu0 %v300_v1, %s1487_s12 }
  0x29   : > { %629 = vrot.lane.b32.xlu1 %v300_v1, %s1488_s13  ;;  %626 = vrot.lane.b32.xlu0 %v302_v2, %s1488_s13 }
  0x2d   : > { %1146 = vrot.lane.b32.xlu1 %v302_v2, %s1489_s14  ;;  %1144 = vrot.lane.b32.xlu0 %v300_v1, %s1489_s14 }
  0x83   : > { %v818_v10 = vpop.permute.xlu1 %817  ;;  %v332_v11 = vpop.permute.xlu0 %331 }
  0x87   : > { %v820_v17 = vpop.permute.xlu1 %819  ;;  %v329_v18 = vpop.permute.xlu0 %328 }
  0x88   : > { %v822_v21 = vsel %vm821_vm2, %v818_v10, %v820_v17  ;;  %v826_v22 = vsel %vm821_vm2, %v820_v17, %v818_v10  ;;  %v334_v23 = vsel %vm333_vm3, %v332_v11, %v329_v18  ;;  %v337_v24 = vsel %vm333_vm3, %v329_v18, %v332_v11  ;;  %v1426_v10 = vld [vmem:[%s1676_s1 + $0x38] sm:$0xff] }
  0x89   : > { %v840_v25 = vmul.f32 %v833_v13, %v822_v21  ;;  %v841_v26 = vmul.f32 %v837_v14, %v826_v22  ;;  %v351_v27 = vmul.f32 %v344_v15, %v337_v24  ;;  %v352_v28 = vmul.f32 %v348_v16, %v334_v23  ;;  %v1407_v24 = vld [vmem:[%s1676_s1 + $0x18] sm:$0xff] }
  0x8a   : > { %v1160_v15 = vrot.slane %v1430_v8, %v1556_v6  ;;  %v1164_v18 = vrot.slane %v1430_v8, %v1558_v7  ;;  %v1431_v7 = vld [vmem:[%s1676_s1 + $0x40] sm:$0xff] }
  0x8b   : > { %v307_v32 = vpop.permute.xlu1 %306  ;;  %1395 = vmatprep.subr.msk.mxu1 %vm359_vm0, %v352_v28  ;;  %v304_v33 = vpop.permute.xlu0 %303  ;;  %1417 = vmatprep.subr.msk.mxu0 %vm359_vm0, %v841_v26 }
  0x8c   : > { %v309_v34 = vsel %vm308_vm4, %v307_v32, %v304_v33  ;;  %v312_v35 = vsel %vm308_vm4, %v304_v33, %v307_v32  ;;  %1396 = vmatpush1.msk.msra.mxu1 %vm359_vm0, %v351_v27  ;;  %1418 = vmatpush1.msk.msra.mxu0 %vm359_vm0, %v840_v25 }
  0x8d   : > { %v325_v37 = vmul.f32 %v318_v19, %v312_v35  ;;  %v326_v38 = vmul.f32 %v322_v20, %v309_v34  ;;  %1397 = vmatmul.mubr.msk.f32.vlgmr.msra.gmra.mrb[0].mxu1 %vm355_vm1, %v1394_v30  ;;  %1419 = vmatmul.mubr.msk.f32.vlgmr.msra.gmra.mrb[0].mxu0 %vm355_vm1, %v1416_v31 }
  0x8e   : > { %510 = vmatprep.mubr.f32.mxu1 %v1481_v0  ;;  %1026 = vmatprep.mubr.f32.mxu0 %v1481_v0 }
  0x8f   : > { %v929_v41 = vpop.permute.xlu1 %928  ;;  %1398 = vmatprep.subr.msk.mxu1 %vm359_vm0, %v326_v38  ;;  %v927_v42 = vpop.permute.xlu0 %926 }
  0x90   : > { %v931_v43 = vsel %vm930_vm5, %v927_v42, %v929_v41  ;;  %v935_v44 = vsel %vm930_vm5, %v929_v41, %v927_v42  ;;  %1399 = vmatpush1.msk.msra.mxu1 %vm359_vm0, %v325_v37 }
  0x91   : > { %v949_v45 = vmul.f32 %v942_v36, %v931_v43  ;;  %v950_v46 = vmul.f32 %v946_v39, %v935_v44 }
  0x93   : > { %v521_v52 = vpop.permute.xlu1 %520  ;;  %v518_v53 = vpop.permute.xlu0 %517  ;;  %1422 = vmatprep.subr.msk.mxu0 %vm359_vm0, %v950_v46 }
  0x94   : > { %v523_v54 = vsel %vm522_vm6, %v521_v52, %v518_v53  ;;  %v526_v55 = vsel %vm522_vm6, %v518_v53, %v521_v52  ;;  %1423 = vmatpush1.msk.msra.mxu0 %vm359_vm0, %v949_v45 }
  0x95   : > { %v540_v57 = vmul.f32 %v533_v47, %v526_v55  ;;  %v541_v58 = vmul.f32 %v537_v48, %v523_v54  ;;  %1400 = vmatmul.mubr.msk.f32.vlgmr.msra.gmra.mrb[0].mxu1 %vm355_vm1, %v327_v50  ;;  %1424 = vmatmul.mubr.msk.f32.vlgmr.msra.gmra.mrb[0].mxu0 %vm355_vm1, %v1421_v51 }
  0x96   : > { %617 = vmatprep.mubr.f32.mxu1 %v1481_v0  ;;  %1135 = vmatprep.mubr.f32.mxu0 %v1481_v0 }
  0x97   : > { %v1038_v61 = vpop.permute.xlu1 %1037  ;;  %1403 = vmatprep.subr.msk.mxu1 %vm359_vm0, %v541_v58  ;;  %v1036_v62 = vpop.permute.xlu0 %1035 }
  0x98   : > { %v1040_v63 = vsel %vm1039_vm7, %v1036_v62, %v1038_v61  ;;  %v1044_v1 = vsel %vm1039_vm7, %v1038_v61, %v1036_v62  ;;  %1404 = vmatpush1.msk.msra.mxu1 %vm359_vm0, %v540_v57 }
  0x99   : > { %v1058_v2 = vmul.f32 %v1051_v56, %v1040_v63  ;;  %v1059_v3 = vmul.f32 %v1055_v59, %v1044_v1 }
  0x9b   : > { %v630_v11 = vpop.permute.xlu1 %629  ;;  %v627_v12 = vpop.permute.xlu0 %626  ;;  %1427 = vmatprep.subr.msk.mxu0 %vm359_vm0, %v1059_v3 }
  0x9c   : > { %v632_v13 = vsel %vm631_vm8, %v630_v11, %v627_v12  ;;  %v635_v14 = vsel %vm631_vm8, %v627_v12, %v630_v11  ;;  %1428 = vmatpush1.msk.msra.mxu0 %vm359_vm0, %v1058_v2 }
  0x9d   : > { %v649_v16 = vmul.f32 %v642_v4, %v635_v14  ;;  %v650_v17 = vmul.f32 %v646_v5, %v632_v13  ;;  %1405 = vmatmul.mubr.msk.f32.vlgmr.msra.gmra.mrb[0].mxu1 %vm355_vm1, %v1402_v9  ;;  %1429 = vmatmul.mubr.msk.f32.vlgmr.msra.gmra.mrb[0].mxu0 %vm355_vm1, %v1426_v10 }
  0x9e   : > { %726 = vmatprep.mubr.f32.mxu1 %v1481_v0  ;;  %1244 = vmatprep.mubr.f32.mxu0 %v1481_v0 }
  0x9f   : > { %v1147_v19 = vpop.permute.xlu1 %1146  ;;  %1408 = vmatprep.subr.msk.mxu1 %vm359_vm0, %v650_v17  ;;  %v1145_v20 = vpop.permute.xlu0 %1144 }
  0xa0   : > { %v1149_v21 = vsel %vm1148_vm9, %v1145_v20, %v1147_v19  ;;  %v1153_v6 = vsel %vm1148_vm9, %v1147_v19, %v1145_v20  ;;  %1409 = vmatpush1.msk.msra.mxu1 %vm359_vm0, %v649_v16 }
  0xa1   : > { %v1167_v22 = vmul.f32 %v1160_v15, %v1149_v21  ;;  %v1168_v23 = vmul.f32 %v1164_v18, %v1153_v6 }
  0xa3   : > { %1432 = vmatprep.subr.msk.mxu0 %vm359_vm0, %v1168_v23 }
  0xa4   : > { %1433 = vmatpush1.msk.msra.mxu0 %vm359_vm0, %v1167_v22 }
  0xa5   : > { %1410 = vmatmul.mubr.msk.f32.vlgmr.msra.gmra.mrb[0].mxu1 %vm355_vm1, %v1407_v24  ;;  %1434 = vmatmul.mubr.msk.f32.vlgmr.msra.gmra.mrb[0].mxu0 %vm355_vm1, %v1431_v7 }
 0x178   : > { %v728_v0 = vpop.f32.mrb[0].mxu1  ;;  %v1246_v25 = vpop.f32.mrb[0].mxu0 }
 0x179   : > { %v1439_v26 = vadd.f32 %v1246_v25, %v728_v0  ;;  %v730_v27 = vpop.f32.mrb[1].mxu1  ;;  %v1248_v28 = vpop.f32.mrb[1].mxu0 }
 0x17a   : > { %v1440_v29 = vadd.f32 %v1248_v28, %v730_v27 }
 0x17b   : > { %1253 = vst [vmem:[%s291_s29] sm:$0xff] %v1439_v26  ;;  %v1259_v30 = vmul.f32 %v1439_v26, %v1439_v26 }
 0x17c   : > { %1254 = vst [vmem:[%s291_s29 + $0x8] sm:$0xff] %v1440_v29  ;;  %v1255_v31 = vadd.f32 %v1440_v29, %v1439_v26  ;;  %v1260_v32 = vmul.f32 %v1440_v29, %v1440_v29 }
 0x17e   : > { %1256 = vadd.xlane.f32.xlu0 %v1255_v31  ;;  %v1261_v33 = vadd.f32 %v1260_v32, %v1259_v30 }
 0x180   : > { %1262 = vadd.xlane.f32.xlu1 %v1261_v33 }
 0x20b   : > { %v1257_v34 = vpop.xlane.xlu0 %1256 }
 0x20c   : > { %1258 = vst.msk [vmem:[%s295_s8] sm:$0xff] %vm631_vm8, %v1257_v34 }
 0x20d   : > { %v1263_v35 = vpop.xlane.xlu1 %1262 }
 0x20e   : > { %1264 = vst.msk [vmem:[%s299_s11] sm:$0xff] %vm631_vm8, %v1263_v35 }
 0x20f PF: > { %s18_s24 = sadd.s32 1, %s1479_s24  }
 0x210   : > { %p15_p4 = scmp.ge.s32.totalorder %s18_s24, 4  }
 0x212   :  { %17 = sbr.rel (!%p15_p4) target bundleno = 1 (0x1), region = 109 }

// kernel: double_conv.4
= control target key start
LH: loop header
LB: loop body
LE: loop exit
PB: predicated region body
PF: predicated region fallthrough
CT: control target
= control target key end

     0   :  { %s1480_s24 = smov 0   ;;  %s1610_s0 = inlined_call_operand.vmem [shape: f32[2,8,256], index: 0, kind: input, shape index: {}]   ;;  %s1611_s1 = inlined_call_operand.vmem [shape: f32[9,8,8], index: 1, kind: input, shape index: {}]   ;;  %s1612_s2 = inlined_call_operand.vmem [shape: f32[9,1,256], index: 2, kind: input, shape index: {}]   ;;  %s1613_s3 = inlined_call_operand.vmem [shape: f32[8,1], index: 3, kind: input, shape index: {}]   ;;  %s1614_s4 = inlined_call_operand.vmem [shape: f32[8,1], index: 4, kind: input, shape index: {}]   ;;  %s1615_s5 = inlined_call_operand.vmem [shape: f32[2,8,256], index: 5, kind: output, shape index: {0}]   ;;  %s1616_s6 = inlined_call_operand.vmem [shape: f32[2,8,1], index: 6, kind: output, shape index: {1}]   ;;  %s1617_s7 = inlined_call_operand.vmem [shape: f32[2,8,1], index: 7, kind: output, shape index: {2}]  }
   0x1 LB: > { %s1348_s25 = sadd.s32 4294967295, %s1428_s24   ;;  %p1352_p0 = scmp.ge.s32.totalorder %s1428_s24, 1  ;;  %s1428_s24 = sphi %s1480_s24, %s18_s24  }
   0x2   : > { %p242_p1 = scmp.lt.s32.totalorder %s1428_s24, 3 }
   0x4   : > { %p243_p2 = pnand %p1352_p0, %p242_p1 }
   0x5   : > { %v302_v0 = vld [vmem:[%s1613_s3] sm:$0xff] (!%p243_p2)  ;;  %v1430_v1 = vmov (!%p243_p2), 0   ;;  %p282_p3 = scmp.lt.s32.totalorder (!%p243_p2), %s1348_s25, 1  ;;  %v1431_v6 = vmov (!%p243_p2), 0.0   ;;  %vm374_vm0 = vcmask (!%p243_p2), 64512   ;;  %s1432_s13 = smov (!%p243_p2), 16   ;;  %v334_v15 = vlaneseq (!%p243_p2) }
   0x6   : > { %246 = sbr.rel (%p243_p2) target bundleno = 657 (0x291), region = 40  ;;  %1421 = vset.pattern.permute.xlu0 (!%p243_p2), %v1430_v1  ;;  %v310_v2 = vld [vmem:[%s1614_s4] sm:$0xff] (!%p243_p2)  ;;  %798 = vmatprep.mubr.f32.mxu0 (!%p243_p2), %v1431_v6  ;;  %s1433_s14 = smov (!%p243_p2), 127   ;;  %vm352_vm1 = vcmask (!%p243_p2), 130048   ;;  %v1371_v24 = vld [vmem:[%s1612_s2 + $0xa] sm:$0x3] (!%p243_p2) }
   0x7   : > { %305 = vperm.xlu0 (!%p243_p2), %1421, %v302_v0   ;;  %442 = vmatprep.mubr.f32.mxu1 (!%p243_p2), %v1431_v6  ;;  %v1369_v14 = vld [vmem:[%s1611_s1 + $0x20] sm:$0xff] (!%p243_p2)  ;;  %s1434_s15 = smov (!%p243_p2), 17   ;;  %s1435_s16 = smov (!%p243_p2), 113   ;;  %v335_v16 = vshrl.u32 (!%p243_p2), %v334_v15, 7  ;;  %vm811_vm2 = vcmask (!%p243_p2), 1039360   ;;  %v1360_v33 = vld [vmem:[%s1611_s1 + $0x8] sm:$0xff] (!%p243_p2) }
   0x8   : > { %s1436_s17 = smov (!%p243_p2), 15   ;;  %s1437_s18 = smov (!%p243_p2), 112   ;;  %v1359_v19 = vld [vmem:[%s1612_s2 + $0x2] sm:$0x3] (!%p243_p2)  ;;  %v332_v34 = vld [vmem:[%s1612_s2] sm:$0x3] (!%p243_p2) }
   0x9   : > { %s1438_s19 = smov (!%p243_p2), 1   ;;  %s1439_s20 = smov (!%p243_p2), 111   ;;  %v1509_v17 = vsub.s32 (!%p243_p2), 1, %v335_v16  ;;  %v1511_v18 = vsub.s32 (!%p243_p2), 0, %v335_v16  ;;  %vm327_vm3 = vcmask (!%p243_p2), 138240   ;;  %v1372_v43 = vld [vmem:[%s1611_s1 + $0x28] sm:$0xff] (!%p243_p2) }
   0xa   : > { %v1374_v44 = vld [vmem:[%s1612_s2 + $0xc] sm:$0x3] (!%p243_p2)  ;;  %vm914_vm4 = vcmask (!%p243_p2), 924672   ;;  %v346_v53 = vld [vmem:[%s1611_s1] sm:$0xff] (!%p243_p2)  ;;  %vm528_vm5 = vcmask (!%p243_p2), 121856   ;;  %v1375_v62 = vld [vmem:[%s1611_s1 + $0x30] sm:$0xff] (!%p243_p2) }
   0xb   : > { %313 = vperm.xlu0 (!%p243_p2), %1421, %v310_v2   ;;  %v367_v22 = vrot.slane (!%p243_p2), %v1359_v19, %v1509_v17  ;;  %v363_v23 = vrot.slane (!%p243_p2), %v1359_v19, %v1511_v18  ;;  %v823_v30 = vrot.slane (!%p243_p2), %v1371_v24, %v1511_v18  ;;  %v827_v31 = vrot.slane (!%p243_p2), %v1371_v24, %v1509_v17  ;;  %v1363_v54 = vld [vmem:[%s1612_s2 + $0x4] sm:$0x3] (!%p243_p2)  ;;  %v1377_v63 = vld [vmem:[%s1612_s2 + $0xe] sm:$0x3] (!%p243_p2) }
   0xc   : > { %v337_v41 = vrot.slane (!%p243_p2), %v332_v34, %v1511_v18  ;;  %v341_v42 = vrot.slane (!%p243_p2), %v332_v34, %v1509_v17  ;;  %v926_v51 = vrot.slane (!%p243_p2), %v1374_v44, %v1511_v18  ;;  %v930_v52 = vrot.slane (!%p243_p2), %v1374_v44, %v1509_v17 }
   0xd   : > { %s1619_s25 = smov (!%p282_p3, %s1348_s25), 1  ;;  %v539_v60 = vrot.slane %v1363_v54, %v1511_v18  ;;  %v543_v61 = vrot.slane %v1363_v54, %v1509_v17  ;;  %vm1017_vm6 = vcmask 916480   ;;  %vm631_vm7 = vcmask 7168  }
   0xe   : > { %s1385_s30 = sshll.u32 %s1619_s25, 4  ;;  %vm1120_vm8 = vcmask 908288  }
   0xf   : > { %s286_s10 = scalar_lea.vmem %s1610_s0, %s1385_s30 }
  0x10   : > { %v300_v4 = vld [vmem:[%s286_s10] sm:$0xff]  ;;  %v301_v5 = vld [vmem:[%s286_s10 + $0x8] sm:$0xff] }
  0x86   : > { %v306_v3 = vpop.permute.xlu0 %305 }
  0x87   : > { %v308_v7 = vmul.f32 %v306_v3, %v300_v4  ;;  %v309_v8 = vmul.f32 %v306_v3, %v301_v5 }
  0x8a   : > { %v314_v9 = vpop.permute.xlu0 %313 }
  0x8b   : > { %v316_v10 = vadd.f32 %v314_v9, %v308_v7  ;;  %v317_v11 = vadd.f32 %v314_v9, %v309_v8  ;;  %v1029_v7 = vrot.slane %v1377_v63, %v1511_v18  ;;  %v1033_v8 = vrot.slane %v1377_v63, %v1509_v17  ;;  %v1364_v9 = vld [vmem:[%s1611_s1 + $0x10] sm:$0xff] }
  0x8d   : > { %v318_v12 = vmax.f32 %v316_v10, 0.0  ;;  %v319_v13 = vmax.f32 %v317_v11, 0.0  ;;  %v1366_v10 = vld [vmem:[%s1612_s2 + $0x6] sm:$0x3] }
  0x8e   : > { %v642_v19 = vrot.slane %v1366_v10, %v1511_v18 }
  0x8f   : > { %347 = vrot.lane.b32.xlu1 %v319_v13, %s1432_s13  ;;  %734 = vmatprep.subr.mxu0 %v319_v13 }
  0x90   : > { %807 = vrot.lane.b32.xlu0 %v318_v12, %s1433_s14  ;;  %735 = vmatpush1.msra.mxu0 %v318_v12 }
  0x91   : > { %1370 = vmatmul.mubr.msk.f32.vlgmr.msra.gmra.mrb[0].mxu0 %vm374_vm0, %v1369_v14 }
  0x92   : > { %901 = vmatprep.mubr.f32.mxu0 %v1431_v6 }
  0x93   : > { %350 = vrot.lane.b32.xlu1 %v318_v12, %s1432_s13 }
  0x94   : > { %321 = vrot.lane.b32.xlu0 %v319_v13, %s1434_s15 }
  0x97   : > { %809 = vrot.lane.b32.xlu1 %v319_v13, %s1433_s14 }
  0x98   : > { %910 = vrot.lane.b32.xlu0 %v318_v12, %s1435_s16 }
  0x9b   : > { %325 = vrot.lane.b32.xlu1 %v318_v12, %s1434_s15  ;;  %s291_s15 = scalar_lea.vmem %s1615_s5, %s1385_s30 }
  0x9c   : > { %523 = vrot.lane.b32.xlu0 %v319_v13, %s1436_s17 }
  0x9f   : > { %912 = vrot.lane.b32.xlu1 %v319_v13, %s1435_s16  ;;  %s1357_s16 = sshll.u32 %s1619_s25, 3 }
  0xa0   : > { %1013 = vrot.lane.b32.xlu0 %v318_v12, %s1437_s18  ;;  %s299_s21 = scalar_lea.vmem %s1617_s7, %s1357_s16 }
  0xa3   : > { %526 = vrot.lane.b32.xlu1 %v318_v12, %s1436_s17 }
  0xa4   : > { %626 = vrot.lane.b32.xlu0 %v319_v13, %s1438_s19 }
  0xa7   : > { %1015 = vrot.lane.b32.xlu1 %v319_v13, %s1437_s18 }
  0xa8   : > { %1116 = vrot.lane.b32.xlu0 %v318_v12, %s1439_s20 }
  0xab   : > { %629 = vrot.lane.b32.xlu1 %v318_v12, %s1438_s19  ;;  %s295_s19 = scalar_lea.vmem %s1616_s6, %s1357_s16 }
  0xaf   : > { %1118 = vrot.lane.b32.xlu1 %v319_v13, %s1439_s20 }
 0x101   : > { %v348_v20 = vpop.permute.xlu1 %347 }
 0x102   : > { %v808_v21 = vpop.permute.xlu0 %807 }
 0x105   : > { %v351_v25 = vpop.permute.xlu1 %350 }
 0x106   : > { %v322_v26 = vpop.permute.xlu0 %321  ;;  %v356_v27 = vsel %vm352_vm1, %v348_v20, %v351_v25  ;;  %v353_v28 = vsel %vm352_vm1, %v351_v25, %v348_v20  ;;  %v646_v20 = vrot.slane %v1366_v10, %v1509_v17 }
 0x107   : > { %v371_v29 = vmul.f32 %v367_v22, %v353_v28  ;;  %v370_v32 = vmul.f32 %v363_v23, %v356_v27  ;;  %v1380_v22 = vld [vmem:[%s1612_s2 + $0x10] sm:$0x3] }
 0x108   : > { %v1132_v28 = vrot.slane %v1380_v22, %v1511_v18 }
 0x109   : > { %378 = vmatprep.subr.mxu1 %v371_v29  ;;  %v810_v35 = vpop.permute.xlu1 %809  ;;  %v1136_v29 = vrot.slane %v1380_v22, %v1509_v17  ;;  %v1381_v17 = vld [vmem:[%s1611_s1 + $0x40] sm:$0xff] }
 0x10a   : > { %v911_v36 = vpop.permute.xlu0 %910  ;;  %v812_v37 = vsel %vm811_vm2, %v808_v21, %v810_v35  ;;  %v816_v38 = vsel %vm811_vm2, %v810_v35, %v808_v21  ;;  %379 = vmatpush1.msra.mxu1 %v370_v32  ;;  %v1378_v21 = vld [vmem:[%s1611_s1 + $0x38] sm:$0xff] }
 0x10b   : > { %v830_v39 = vmul.f32 %v823_v30, %v812_v37  ;;  %v831_v40 = vmul.f32 %v827_v31, %v816_v38  ;;  %1361 = vmatmul.mubr.msk.f32.vlgmr.msra.gmra.mrb[0].mxu1 %vm374_vm0, %v1360_v33  ;;  %v1367_v30 = vld [vmem:[%s1611_s1 + $0x18] sm:$0xff] }
 0x10c   : > { %516 = vmatprep.mubr.f32.mxu1 %v1431_v6 }
 0x10d   : > { %v326_v45 = vpop.permute.xlu1 %325  ;;  %837 = vmatprep.subr.mxu0 %v831_v40 }
 0x10e   : > { %v328_v46 = vsel %vm327_vm3, %v326_v45, %v322_v26  ;;  %v331_v47 = vsel %vm327_vm3, %v322_v26, %v326_v45  ;;  %838 = vmatpush1.msra.mxu0 %v830_v39  ;;  %v524_v48 = vpop.permute.xlu0 %523 }
 0x10f   : > { %v344_v49 = vmul.f32 %v337_v41, %v331_v47  ;;  %v345_v50 = vmul.f32 %v341_v42, %v328_v46  ;;  %1373 = vmatmul.mubr.msk.f32.vlgmr.msra.gmra.mrb[0].mxu0 %vm374_vm0, %v1372_v43 }
 0x110   : > { %1004 = vmatprep.mubr.f32.mxu0 %v1431_v6 }
 0x111   : > { %452 = vmatprep.subr.mxu1 %v345_v50  ;;  %v913_v55 = vpop.permute.xlu1 %912 }
 0x112   : > { %v915_v56 = vsel %vm914_vm4, %v911_v36, %v913_v55  ;;  %v919_v57 = vsel %vm914_vm4, %v913_v55, %v911_v36  ;;  %453 = vmatpush1.msra.mxu1 %v344_v49  ;;  %v1014_v0 = vpop.permute.xlu0 %1013 }
 0x113   : > { %v933_v58 = vmul.f32 %v926_v51, %v915_v56  ;;  %v934_v59 = vmul.f32 %v930_v52, %v919_v57  ;;  %1362 = vmatmul.mubr.msk.f32.vlgmr.msra.gmra.mrb[0].mxu1 %vm374_vm0, %v346_v53 }
 0x114   : > { %617 = vmatprep.mubr.f32.mxu1 %v1431_v6 }
 0x115   : > { %v527_v1 = vpop.permute.xlu1 %526  ;;  %940 = vmatprep.subr.mxu0 %v934_v59 }
 0x116   : > { %v529_v2 = vsel %vm528_vm5, %v527_v1, %v524_v48  ;;  %v532_v3 = vsel %vm528_vm5, %v524_v48, %v527_v1  ;;  %941 = vmatpush1.msra.mxu0 %v933_v58  ;;  %v627_v14 = vpop.permute.xlu0 %626 }
 0x117   : > { %v546_v4 = vmul.f32 %v539_v60, %v532_v3  ;;  %v547_v5 = vmul.f32 %v543_v61, %v529_v2  ;;  %1376 = vmatmul.mubr.msk.f32.vlgmr.msra.gmra.mrb[0].mxu0 %vm374_vm0, %v1375_v62 }
 0x118   : > { %1107 = vmatprep.mubr.f32.mxu0 %v1431_v6 }
 0x119   : > { %553 = vmatprep.subr.mxu1 %v547_v5  ;;  %v1016_v11 = vpop.permute.xlu1 %1015 }
 0x11a   : > { %v1018_v12 = vsel %vm1017_vm6, %v1014_v0, %v1016_v11  ;;  %v1022_v13 = vsel %vm1017_vm6, %v1016_v11, %v1014_v0  ;;  %554 = vmatpush1.msra.mxu1 %v546_v4  ;;  %v1117_v31 = vpop.permute.xlu0 %1116 }
 0x11b   : > { %v1036_v15 = vmul.f32 %v1029_v7, %v1018_v12  ;;  %v1037_v16 = vmul.f32 %v1033_v8, %v1022_v13  ;;  %1365 = vmatmul.mubr.msk.f32.vlgmr.msra.gmra.mrb[0].mxu1 %vm374_vm0, %v1364_v9 }
 0x11c   : > { %720 = vmatprep.mubr.f32.mxu1 %v1431_v6 }
 0x11d   : > { %v630_v23 = vpop.permute.xlu1 %629  ;;  %1043 = vmatprep.subr.mxu0 %v1037_v16 }
 0x11e   : > { %v632_v24 = vsel %vm631_vm7, %v630_v23, %v627_v14  ;;  %v635_v25 = vsel %vm631_vm7, %v627_v14, %v630_v23  ;;  %1044 = vmatpush1.msra.mxu0 %v1036_v15 }
 0x11f   : > { %v649_v26 = vmul.f32 %v642_v19, %v635_v25  ;;  %v650_v27 = vmul.f32 %v646_v20, %v632_v24  ;;  %1379 = vmatmul.mubr.msk.f32.vlgmr.msra.gmra.mrb[0].mxu0 %vm374_vm0, %v1378_v21 }
 0x120   : > { %1210 = vmatprep.mubr.f32.mxu0 %v1431_v6 }
 0x121   : > { %656 = vmatprep.subr.mxu1 %v650_v27  ;;  %v1119_v32 = vpop.permute.xlu1 %1118 }
 0x122   : > { %v1121_v33 = vsel %vm1120_vm8, %v1117_v31, %v1119_v32  ;;  %v1125_v34 = vsel %vm1120_vm8, %v1119_v32, %v1117_v31  ;;  %657 = vmatpush1.msra.mxu1 %v649_v26 }
 0x123   : > { %v1139_v35 = vmul.f32 %v1132_v28, %v1121_v33  ;;  %v1140_v36 = vmul.f32 %v1136_v29, %v1125_v34  ;;  %1368 = vmatmul.mubr.msk.f32.vlgmr.msra.gmra.mrb[0].mxu1 %vm374_vm0, %v1367_v30 }
 0x125   : > { %1146 = vmatprep.subr.mxu0 %v1140_v36 }
 0x126   : > { %1147 = vmatpush1.msra.mxu0 %v1139_v35 }
 0x127   : > { %1382 = vmatmul.mubr.msk.f32.vlgmr.msra.gmra.mrb[0].mxu0 %vm374_vm0, %v1381_v17 }
 0x1f6   : > { %v722_v6 = vpop.f32.mrb[0].mxu1 }
 0x1f7   : > { %v724_v18 = vpop.f32.mrb[1].mxu1 }
 0x1fa   : > { %v1212_v37 = vpop.f32.mrb[0].mxu0 }
 0x1fb   : > { %v1387_v38 = vadd.f32 %v1212_v37, %v722_v6  ;;  %v1214_v39 = vpop.f32.mrb[1].mxu0 }
 0x1fc   : > { %v1388_v40 = vadd.f32 %v1214_v39, %v724_v18 }
 0x1fd   : > { %1219 = vst [vmem:[%s291_s15] sm:$0xff] %v1387_v38  ;;  %v1225_v41 = vmul.f32 %v1387_v38, %v1387_v38 }
 0x1fe   : > { %1220 = vst [vmem:[%s291_s15 + $0x8] sm:$0xff] %v1388_v40  ;;  %v1221_v42 = vadd.f32 %v1388_v40, %v1387_v38  ;;  %v1226_v43 = vmul.f32 %v1388_v40, %v1388_v40 }
 0x200   : > { %1222 = vadd.xlane.f32.xlu0 %v1221_v42  ;;  %v1227_v44 = vadd.f32 %v1226_v43, %v1225_v41 }
 0x202   : > { %1228 = vadd.xlane.f32.xlu1 %v1227_v44 }
 0x28d   : > { %v1223_v45 = vpop.xlane.xlu0 %1222 }
 0x28e   : > { %1224 = vst.msk [vmem:[%s295_s19] sm:$0xff] %vm631_vm7, %v1223_v45 }
 0x28f   : > { %v1229_v46 = vpop.xlane.xlu1 %1228 }
 0x290   : > { %1230 = vst.msk [vmem:[%s299_s21] sm:$0xff] %vm631_vm7, %v1229_v46 }
 0x291 PF: > { %s18_s24 = sadd.s32 1, %s1428_s24  }
 0x292   : > { %p15_p4 = scmp.ge.s32.totalorder %s18_s24, 4  }
 0x294   :  { %17 = sbr.rel (!%p15_p4) target bundleno = 1 (0x1), region = 109 }

</bundles_post_ra>
